<compile_context>
chip_gen: v7x
topology: tpu7x:2x2x1
jax: 0.10.0
libtpu: 0.0.40
codegen_flags: <defaults>
</compile_context>

<pallas_src>
import functools

import jax
import jax.numpy as jnp
import numpy as np
from jax.experimental import pallas as pl
from jax.experimental.pallas import tpu as pltpu


def _antideriv_tanh(z):
    # antiderivTanh(x) = |x| + log(1 + exp(-2|x|))
    az = jnp.abs(z)
    return az + jnp.log1p(jnp.exp(-2.0 * az))


def _round_up(x, n):
    return ((x + n - 1) // n) * n


def _num_tensorcores():
    """Best-effort TensorCores-per-chip query (2 on v7x, 1 on v5e/v6e)."""
    try:
        info = pltpu.get_tpu_info()
        for attr in ("num_cores", "cores_per_chip", "num_tensorcores",
                     "tensorcore_count"):
            if hasattr(info, attr):
                n = int(getattr(info, attr))
                if n > 0:
                    return n
    except Exception:
        pass
    try:
        kind = jax.devices()[0].device_kind.lower()
        if "v7" in kind or "7x" in kind:
            return 2
    except Exception:
        pass
    return 1


def phi_kernel(xt_ref, p_ref, wi_ref, bi_ref, w_ref, out_ref, *,
               n_layers, m_pad, r_pad):
    # One fused contraction over the tiny feature axis (bf16 ops, f32 acc):
    #   pre = [W0|b0 ; A|0 ; cw|cb] @ [x^T ; 1]   -> (m_pad + r_pad + 8, bm)
    pre = jnp.dot(p_ref[...], xt_ref[...],
                  preferred_element_type=jnp.float32)

    # ---- ResNN (transposed): u = act(W0 x + b0); u = u + h*act(Wi u + bi) ---
    u = _antideriv_tanh(pre[:m_pad, :])                      # (m_pad, bm) f32
    h = 1.0 / (n_layers - 1)
    for i in range(n_layers - 1):                            # static unroll
        z = jnp.dot(wi_ref[i], u.astype(jnp.bfloat16),
                    preferred_element_type=jnp.float32) + bi_ref[i]
        u = u + h * _antideriv_tanh(z)

    # ---- w'·N(x): rank-1 dot -> VPU multiply + sublane reduce --------------
    term_w = jnp.sum(u * w_ref[...], axis=0, keepdims=True)  # (1, bm)

    # ---- 0.5 * x'A'Ax == 0.5 * ||A x||^2 ; zero-padded A rows add nothing --
    ax = pre[m_pad:m_pad + r_pad, :]
    term_q = 0.5 * jnp.sum(ax * ax, axis=0, keepdims=True)   # (1, bm)

    # ---- c(x) = cw'x + cb fell out of the fused dot; padded rows are zero --
    term_c = jnp.sum(pre[m_pad + r_pad:, :], axis=0, keepdims=True)

    # Lane-dense store: one (1, bm) full-lane row per grid step.
    out_ref[...] = (term_w + term_q + term_c).astype(out_ref.dtype)


def _plan_tiles(nex, block_m, num_tc):
    """Pick (bm, nex_pad), generation-aware.

    Single-TC chips (v5e/v6e): never split the grid just to "parallelize";
    use the fewest, largest tiles.  2-TC chips (v7x): even number of grid
    steps (>= 4 when nex allows) so both TensorCores get balanced, pipelined
    work.  Multi-step grids use 128-multiple lane tiles (unmasked stores)."""
    block_m = max(128, _round_up(block_m, 128))

    if num_tc <= 1 or nex < 256:
        if nex <= block_m:
            bm = max(8, _round_up(nex, 8 if nex < 128 else 128))
            return bm, bm
        steps = -(-nex // block_m)
        bm = max(128, _round_up(-(-nex // steps), 128))
        return bm, _round_up(nex, bm)

    steps = max(2, -(-nex // block_m))
    if nex >= 1024 and steps < 4:
        steps = 4                          # >= 2 steps per core
    if steps % 2:
        steps += 1                         # balance the 2 TensorCores
    bm = max(128, _round_up(-(-nex // steps), 128))
    nex_pad = _round_up(nex, bm)
    if (nex_pad // bm) % 2:                # keep the step count even
        nex_pad += bm
    return bm, nex_pad


def phi_forward(x, params, *, n_layers, block_m=8192):
    """x: [nex, d+1] float32 -> [nex, 1] float32."""
    if n_layers < 2:
        raise ValueError("n_layers must be an integer >= 2")
    nex, din = x.shape
    W0, b0 = params["W0"], params["b0"]
    Wi, bi = params["Wi"], params["bi"]
    w, A = params["w"], params["A"]
    cw, cb = params["cw"], params["cb"]
    m, r = W0.shape[0], A.shape[0]
    L1 = Wi.shape[0]
    assert L1 == n_layers - 1

    m_pad = _round_up(m, 8)
    r_pad = _round_up(r, 8)
    c_pad = 8
    K = din + 1                            # extra "ones" feature folds biases

    num_tc = _num_tensorcores()
    bm, nex_pad = _plan_tiles(nex, block_m, num_tc)
    grid = nex_pad // bm

    # ---- stacked weight P = [W0|b0 ; A|0 ; cw|cb], 8-row-aligned sections --
    P = jnp.zeros((m_pad + r_pad + c_pad, K), jnp.float32)
    P = P.at[:m, :din].set(W0)
    P = P.at[:m, din].set(b0[:, 0])
    P = P.at[m_pad:m_pad + r, :din].set(A)
    P = P.at[m_pad + r_pad, :din].set(cw[:, 0])
    P = P.at[m_pad + r_pad, din].set(cb[0, 0])
    P = P.astype(jnp.bfloat16)             # bf16 MXU operand (once)

    Wi_p = (jnp.zeros((L1, m_pad, m_pad), jnp.float32)
            .at[:, :m, :m].set(Wi).astype(jnp.bfloat16))
    bi_p = jnp.zeros((L1, m_pad, 1), jnp.float32).at[:, :m, :].set(bi)
    w_p = jnp.zeros((m_pad, 1), jnp.float32).at[:m, :].set(w)

    # ---- input prep: transpose + ones row + pad, fused with the bf16 cast --
    xt = jnp.concatenate(
        [x.astype(jnp.float32).T, jnp.ones((1, nex), jnp.float32)], axis=0)
    xt = jnp.pad(xt, ((0, 0), (0, nex_pad - nex))).astype(jnp.bfloat16)

    def full(shape):
        nd = len(shape)
        return pl.BlockSpec(shape, lambda i, _nd=nd: (0,) * _nd)

    grid_spec = pltpu.PrefetchScalarGridSpec(
        num_scalar_prefetch=0,
        grid=(grid,),
        in_specs=[
            pl.BlockSpec((K, bm), lambda i: (0, i)),   # [x;1]^T tile (lane-dense)
            full(P.shape),                             # stacked first-layer matrix
            full(Wi_p.shape),                          # Wi stacked (bf16)
            full(bi_p.shape),                          # bi stacked (f32 columns)
            full(w_p.shape),                           # w column (f32)
        ],
        out_specs=pl.BlockSpec((1, bm), lambda i: (0, i)),
    )

    kernel = functools.partial(phi_kernel, n_layers=n_layers,
                               m_pad=m_pad, r_pad=r_pad)
    out_row = pl.pallas_call(
        kernel,
        out_shape=jax.ShapeDtypeStruct((1, nex_pad), jnp.float32),
        grid_spec=grid_spec,
        compiler_params=pltpu.CompilerParams(
            dimension_semantics=("parallel",)),
    )(xt, P, Wi_p, bi_p, w_p)

    return out_row[0, :nex][:, None]


def init_phi_params(key, d, m, n_layers, r=10):
    """Deterministic parameter init mirroring Phi.__init__ shapes/choices."""
    din = d + 1
    r = min(r, din)
    k_A, k_w0, k_b0, k_w1, k_b1 = jax.random.split(key, 5)

    # A: xavier_uniform_ on (r, d+1)
    bound_A = float(np.sqrt(6.0 / (r + din)))
    A = jax.random.uniform(k_A, (r, din), jnp.float32, -bound_A, bound_A)

    # layers[0]: Linear(d+1, m) -- uniform(-1/sqrt(fan_in), 1/sqrt(fan_in))
    b0w = 1.0 / np.sqrt(din)
    W0 = jax.random.uniform(k_w0, (m, din), jnp.float32, -b0w, b0w)
    b0 = jax.random.uniform(k_b0, (m,), jnp.float32, -b0w, b0w)

    # layers[1]: Linear(m, m); layers[2:] are deepcopies of layers[1]
    b1w = 1.0 / np.sqrt(m)
    W1 = jax.random.uniform(k_w1, (m, m), jnp.float32, -b1w, b1w)
    b1 = jax.random.uniform(k_b1, (m,), jnp.float32, -b1w, b1w)
    Wi = jnp.stack([W1] * (n_layers - 1), axis=0)            # (L-1, m, m)
    bi = jnp.stack([b1[:, None]] * (n_layers - 1), axis=0)   # (L-1, m, 1)

    # w: Linear(m, 1, bias=False) with weights set to ones -> column (m, 1)
    w = jnp.ones((m, 1), jnp.float32)
    # c: Linear(d+1, 1) with weight and bias set to zeros
    cw = jnp.zeros((din, 1), jnp.float32)
    cb = jnp.zeros((1, 1), jnp.float32)

    return {"A": A, "W0": W0, "b0": b0[:, None], "Wi": Wi, "bi": bi,
            "w": w, "cw": cw, "cb": cb}


def phi_reference(x, params, n_layers):
    """Pure-JAX f32 reference of Phi.forward (torch formulation)."""
    u = _antideriv_tanh(x @ params["W0"].T + params["b0"][:, 0])
    h = 1.0 / (n_layers - 1)
    for i in range(n_layers - 1):
        u = u + h * _antideriv_tanh(u @ params["Wi"][i].T + params["bi"][i][:, 0])
    symA = params["A"].T @ params["A"]
    quad = 0.5 * jnp.sum((x @ symA) * x, axis=1, keepdims=True)
    return u @ params["w"] + quad + (x @ params["cw"] + params["cb"])


if __name__ == "__main__":
    # Space dim d=3 (inputs are d+1=4 space-time features), hidden m=32,
    # n_layers=3, rank r=10 (clamped to d+1=4).  nex=300 exercises the
    # zero-padded tail and (on v7x) a multi-step "parallel" grid.
    d, m, n_layers, r = 3, 32, 3, 10
    nex = 300

    key = jax.random.PRNGKey(0)
    k_params, k_x = jax.random.split(key)
    params = init_phi_params(k_params, d, m, n_layers, r)
    x = jax.random.normal(k_x, (nex, d + 1), jnp.float32)

    out = phi_forward(x, params, n_layers=n_layers)
    out = jax.block_until_ready(out)

    ref = phi_reference(x, params, n_layers)
    # Tolerance relaxed vs the pure-f32 reference because MXU operands are
    # bf16 (f32 accumulation), per the performance review.  Outputs are O(25)
    # here, so this still catches any real bug.
    np.testing.assert_allclose(np.asarray(out), np.asarray(ref),
                               rtol=3e-2, atol=1e-1)
    print("KERNEL_OK")
</pallas_src>

<mosaic_0001>
module attributes {stable_mosaic.version = 11 : i64} {
  func.func @phi_kernel(%arg0: i32, %arg1: memref<5x384xbf16, #tpu.memory_space<vmem>>, %arg2: memref<48x5xbf16, #tpu.memory_space<vmem>>, %arg3: memref<2x32x32xbf16, #tpu.memory_space<vmem>>, %arg4: memref<2x32x1xf32, #tpu.memory_space<vmem>>, %arg5: memref<32x1xf32, #tpu.memory_space<vmem>>, %arg6: memref<1x384xf32, #tpu.memory_space<vmem>>) attributes {dimension_semantics = [#tpu.dimension_semantics<parallel>], iteration_bounds = array<i64: 1>, scalar_prefetch = 0 : i64, scratch_operands = 0 : i64, tpu.core_type = #tpu.core_type<tc>, window_params = [{transform_indices = @transform_0, window_bounds = array<i64: 5, 384>}, {pipeline_mode = #tpu.pipeline_mode<synchronous>, transform_indices = @transform_1, window_bounds = array<i64: 48, 5>}, {pipeline_mode = #tpu.pipeline_mode<synchronous>, transform_indices = @transform_2, window_bounds = array<i64: 2, 32, 32>}, {pipeline_mode = #tpu.pipeline_mode<synchronous>, transform_indices = @transform_3, window_bounds = array<i64: 2, 32, 1>}, {pipeline_mode = #tpu.pipeline_mode<synchronous>, transform_indices = @transform_4, window_bounds = array<i64: 32, 1>}, {transform_indices = @transform_5, window_bounds = array<i64: 1, 384>}]} {
    %c0 = arith.constant 0 : index
    %c0_0 = arith.constant 0 : index
    %0 = vector.load %arg2[%c0, %c0_0] : memref<48x5xbf16, #tpu.memory_space<vmem>>, vector<48x5xbf16>
    %c0_1 = arith.constant 0 : index
    %c0_2 = arith.constant 0 : index
    %1 = vector.load %arg1[%c0_1, %c0_2] : memref<5x384xbf16, #tpu.memory_space<vmem>>, vector<5x384xbf16>
    %cst = arith.constant dense<0.000000e+00> : vector<48x384xf32>
    %2 = tpu.matmul %0, %1, %cst {dimension_numbers = #tpu.dot_dimension_numbers<[1], [0], [0], [1], [0, 0, 1, 1], [], []>} : vector<48x5xbf16>, vector<5x384xbf16>, vector<48x384xf32> -> vector<48x384xf32>
    %3 = vector.extract_strided_slice %2 {offsets = [0, 0], sizes = [32, 384], strides = [1, 1]} : vector<48x384xf32> to vector<32x384xf32>
    %4 = math.absf %3 : vector<32x384xf32>
    %cst_3 = arith.constant -2.000000e+00 : f32
    %5 = vector.broadcast %cst_3 : f32 to vector<32x384xf32>
    %6 = arith.mulf %5, %4 : vector<32x384xf32>
    %7 = math.exp %6 : vector<32x384xf32>
    %8 = math.log1p %7 : vector<32x384xf32>
    %9 = arith.addf %4, %8 : vector<32x384xf32>
    %c0_4 = arith.constant 0 : index
    %c0_5 = arith.constant 0 : index
    %c0_6 = arith.constant 0 : index
    %10 = vector.load %arg3[%c0_4, %c0_5, %c0_6] : memref<2x32x32xbf16, #tpu.memory_space<vmem>>, vector<1x32x32xbf16>
    %11 = vector.shape_cast %10 : vector<1x32x32xbf16> to vector<32x32xbf16>
    %12 = arith.truncf %9 : vector<32x384xf32> to vector<32x384xbf16>
    %cst_7 = arith.constant dense<0.000000e+00> : vector<32x384xf32>
    %13 = tpu.matmul %11, %12, %cst_7 {dimension_numbers = #tpu.dot_dimension_numbers<[1], [0], [0], [1], [0, 0, 1, 1], [], []>} : vector<32x32xbf16>, vector<32x384xbf16>, vector<32x384xf32> -> vector<32x384xf32>
    %c0_8 = arith.constant 0 : index
    %c0_9 = arith.constant 0 : index
    %c0_10 = arith.constant 0 : index
    %14 = vector.load %arg4[%c0_8, %c0_9, %c0_10] : memref<2x32x1xf32, #tpu.memory_space<vmem>>, vector<1x32x1xf32>
    %15 = vector.shape_cast %14 : vector<1x32x1xf32> to vector<32x1xf32>
    %16 = vector.broadcast %15 : vector<32x1xf32> to vector<32x384xf32>
    %17 = arith.addf %13, %16 : vector<32x384xf32>
    %18 = math.absf %17 : vector<32x384xf32>
    %cst_11 = arith.constant -2.000000e+00 : f32
    %19 = vector.broadcast %cst_11 : f32 to vector<32x384xf32>
    %20 = arith.mulf %19, %18 : vector<32x384xf32>
    %21 = math.exp %20 : vector<32x384xf32>
    %22 = math.log1p %21 : vector<32x384xf32>
    %23 = arith.addf %18, %22 : vector<32x384xf32>
    %cst_12 = arith.constant 5.000000e-01 : f32
    %24 = vector.broadcast %cst_12 : f32 to vector<32x384xf32>
    %25 = arith.mulf %24, %23 : vector<32x384xf32>
    %26 = arith.addf %9, %25 : vector<32x384xf32>
    %c1 = arith.constant 1 : index
    %c0_13 = arith.constant 0 : index
    %c0_14 = arith.constant 0 : index
    %27 = vector.load %arg3[%c1, %c0_13, %c0_14] : memref<2x32x32xbf16, #tpu.memory_space<vmem>>, vector<1x32x32xbf16>
    %28 = vector.shape_cast %27 : vector<1x32x32xbf16> to vector<32x32xbf16>
    %29 = arith.truncf %26 : vector<32x384xf32> to vector<32x384xbf16>
    %cst_15 = arith.constant dense<0.000000e+00> : vector<32x384xf32>
    %30 = tpu.matmul %28, %29, %cst_15 {dimension_numbers = #tpu.dot_dimension_numbers<[1], [0], [0], [1], [0, 0, 1, 1], [], []>} : vector<32x32xbf16>, vector<32x384xbf16>, vector<32x384xf32> -> vector<32x384xf32>
    %c1_16 = arith.constant 1 : index
    %c0_17 = arith.constant 0 : index
    %c0_18 = arith.constant 0 : index
    %31 = vector.load %arg4[%c1_16, %c0_17, %c0_18] : memref<2x32x1xf32, #tpu.memory_space<vmem>>, vector<1x32x1xf32>
    %32 = vector.shape_cast %31 : vector<1x32x1xf32> to vector<32x1xf32>
    %33 = vector.broadcast %32 : vector<32x1xf32> to vector<32x384xf32>
    %34 = arith.addf %30, %33 : vector<32x384xf32>
    %35 = math.absf %34 : vector<32x384xf32>
    %cst_19 = arith.constant -2.000000e+00 : f32
    %36 = vector.broadcast %cst_19 : f32 to vector<32x384xf32>
    %37 = arith.mulf %36, %35 : vector<32x384xf32>
    %38 = math.exp %37 : vector<32x384xf32>
    %39 = math.log1p %38 : vector<32x384xf32>
    %40 = arith.addf %35, %39 : vector<32x384xf32>
    %cst_20 = arith.constant 5.000000e-01 : f32
    %41 = vector.broadcast %cst_20 : f32 to vector<32x384xf32>
    %42 = arith.mulf %41, %40 : vector<32x384xf32>
    %43 = arith.addf %26, %42 : vector<32x384xf32>
    %c0_21 = arith.constant 0 : index
    %c0_22 = arith.constant 0 : index
    %44 = vector.load %arg5[%c0_21, %c0_22] : memref<32x1xf32, #tpu.memory_space<vmem>>, vector<32x1xf32>
    %45 = vector.broadcast %44 : vector<32x1xf32> to vector<32x384xf32>
    %46 = arith.mulf %43, %45 : vector<32x384xf32>
    %cst_23 = arith.constant dense<0.000000e+00> : vector<384xf32>
    %47 = vector.multi_reduction <add>, %46, %cst_23 [0] : vector<32x384xf32> to vector<384xf32>
    %48 = vector.shape_cast %47 : vector<384xf32> to vector<1x384xf32>
    %49 = vector.extract_strided_slice %2 {offsets = [32, 0], sizes = [8, 384], strides = [1, 1]} : vector<48x384xf32> to vector<8x384xf32>
    %50 = arith.mulf %49, %49 : vector<8x384xf32>
    %cst_24 = arith.constant dense<0.000000e+00> : vector<384xf32>
    %51 = vector.multi_reduction <add>, %50, %cst_24 [0] : vector<8x384xf32> to vector<384xf32>
    %52 = vector.shape_cast %51 : vector<384xf32> to vector<1x384xf32>
    %cst_25 = arith.constant 5.000000e-01 : f32
    %53 = vector.broadcast %cst_25 : f32 to vector<1x384xf32>
    %54 = arith.mulf %53, %52 : vector<1x384xf32>
    %55 = vector.extract_strided_slice %2 {offsets = [40, 0], sizes = [8, 384], strides = [1, 1]} : vector<48x384xf32> to vector<8x384xf32>
    %cst_26 = arith.constant dense<0.000000e+00> : vector<384xf32>
    %56 = vector.multi_reduction <add>, %55, %cst_26 [0] : vector<8x384xf32> to vector<384xf32>
    %57 = vector.shape_cast %56 : vector<384xf32> to vector<1x384xf32>
    %58 = arith.addf %48, %54 : vector<1x384xf32>
    %59 = arith.addf %58, %57 : vector<1x384xf32>
    %c0_27 = arith.constant 0 : index
    %c0_28 = arith.constant 0 : index
    %60 = vector.load %arg6[%c0_27, %c0_28] : memref<1x384xf32, #tpu.memory_space<vmem>>, vector<1x384xf32>
    tpu.vector_store %arg6[%c0_27, %c0_28], %59 {strides = array<i32>} : memref<1x384xf32, #tpu.memory_space<vmem>>, vector<1x384xf32>,
    return
  }
  func.func @transform_0(%arg0: i32) -> (i32, i32) {
    %c0_i32 = arith.constant 0 : i32
    %c0_i32_0 = arith.constant 0 : i32
    return %c0_i32, %arg0 : i32, i32
  }
  func.func @transform_1(%arg0: i32) -> (i32, i32) {
    %c0_i32 = arith.constant 0 : i32
    %c0_i32_0 = arith.constant 0 : i32
    %c0_i32_1 = arith.constant 0 : i32
    return %c0_i32, %c0_i32_0 : i32, i32
  }
  func.func @transform_2(%arg0: i32) -> (i32, i32, i32) {
    %c0_i32 = arith.constant 0 : i32
    %c0_i32_0 = arith.constant 0 : i32
    %c0_i32_1 = arith.constant 0 : i32
    %c0_i32_2 = arith.constant 0 : i32
    return %c0_i32, %c0_i32_0, %c0_i32_1 : i32, i32, i32
  }
  func.func @transform_3(%arg0: i32) -> (i32, i32, i32) {
    %c0_i32 = arith.constant 0 : i32
    %c0_i32_0 = arith.constant 0 : i32
    %c0_i32_1 = arith.constant 0 : i32
    %c0_i32_2 = arith.constant 0 : i32
    return %c0_i32, %c0_i32_0, %c0_i32_1 : i32, i32, i32
  }
  func.func @transform_4(%arg0: i32) -> (i32, i32) {
    %c0_i32 = arith.constant 0 : i32
    %c0_i32_0 = arith.constant 0 : i32
    %c0_i32_1 = arith.constant 0 : i32
    return %c0_i32, %c0_i32_0 : i32, i32
  }
  func.func @transform_5(%arg0: i32) -> (i32, i32) {
    %c0_i32 = arith.constant 0 : i32
    %c0_i32_0 = arith.constant 0 : i32
    return %c0_i32, %arg0 : i32, i32
  }
}

</mosaic_0001>

<bundles_post_ra>
// kernel: tpu_custom_call.1
= control target key start
LH: loop header
LB: loop body
LE: loop exit
PB: predicated region body
PF: predicated region fallthrough
CT: control target
= control target key end

     0   :  { %vm63_vm0 = vcmask 1041408   ;;  %vm64_vm1 = vcmask 1042432   ;;  %v1472_v1 = vmov 0.0   ;;  %v1473_v3 = vmov 65535   ;;  %s2235_s0 = inlined_call_operand.vmem [shape: bf16[5,384], index: 0, kind: input, shape index: {}]   ;;  %s2236_s1 = inlined_call_operand.vmem [shape: bf16[48,5], index: 1, kind: input, shape index: {}]   ;;  %s2237_s2 = inlined_call_operand.vmem [shape: bf16[2,32,32], index: 2, kind: input, shape index: {}]   ;;  %s2238_s3 = inlined_call_operand.vmem [shape: f32[2,32,1], index: 3, kind: input, shape index: {}]   ;;  %s2239_s4 = inlined_call_operand.vmem [shape: f32[32,1], index: 4, kind: input, shape index: {}]   ;;  %s2240_s5 = inlined_call_operand.hbm [shape: f32[1,384], index: 5, kind: output, shape index: {}]  }
   0x1   :  { %v28_v0 = vld [vmem:[%s2235_s0] sm:$0x77]  ;;  %1256 = vmatprep.subr.bf16.mxu1 %v1472_v1  ;;  %v65_v4 = vsel %vm63_vm0, 4294967295, %v1473_v3  ;;  %v1295_v5 = vld [vmem:[%s2235_s0 + $0x8] ss:$0 sps:$4 sm:$0x77]  }
   0x2   :  { %v1216_v2 = vcombine.high %v28_v0, %v28_v0  ;;  %v1215_v6 = vcombine.low %v28_v0, %v28_v0  ;;  %v66_v7 = vsel %vm64_vm1, %v65_v4, 0  ;;  %vm1474_vm2 = vmmov 0   ;;  %v1297_v12 = vld [vmem:[%s2236_s1] sm:$0xff]  }
   0x3   :  { %v74_v9 = vand.u32 %v1295_v5, %v66_v7  ;;  %1258 = vmatprep.mubr.msk.bf16.mxu1 %vm1474_vm2, %v1472_v1  ;;  %v2241_v11 = vmov 0   ;;  %vm53_vm3 = vcmask 39936  }
   0x4   :  { %v71_v8 = vand.u32 %v1216_v2, %v66_v7  ;;  %v68_v10 = vand.u32 %v1215_v6, %v66_v7  ;;  %108 = vmatprep.mubr.bf16.mxu0 %v2241_v11  ;;  %1292 = vset.pattern.permute.xlu0 %v2241_v11 }
   0x5   :  { %1293 = vset.pattern.permute.xlu1 %v2241_v11  ;;  %1257 = vmatpush3.bf16.msra.mxu1 %v74_v9 }
   0x6   :  { %76 = vmatprep.subr.bf16.mxu0 %v71_v8 }
   0x7   :  { %77 = vmatpush1.bf16.msra.mxu0 %v68_v10 }
   0x8   :  { %10 = vsyncpa [#allocation3], 0  ;;  %1259 = vmatmul.mubr.msk.bf16.vlgmr.msra.gmra.mrb[0].mxu1 %vm53_vm3, %v1297_v12  ;;  %v1298_v13 = vld [vmem:[%s2236_s1 + $0x8] sm:$0xff]   ;;  %v1299_v14 = vld [vmem:[%s2236_s1 + $0x10] sm:$0xff]   ;;  %vm408_vm4 = vcmask 261120  }
   0x9   :  { %1262 = vmatprep.mubr.msk.bf16.mxu1 %vm1474_vm2, %v1472_v1  ;;  %v1541_v15 = vld [vmem:[%s2237_s2] sm:$0xff]   ;;  %v376_v17 = vld [vmem:[%s2238_s3 + $0x10] sm:$0xff]  ;;  %v375_v18 = vld [vmem:[%s2238_s3 + $0x8] sm:$0xff] }
   0xa   :  { %1218 = vmatmul.mubr.msk.bf16.vlgmr.msra.gmra.mrb[0].mxu0 %vm53_vm3, %v1297_v12  ;;  %v374_v16 = vld [vmem:[%s2238_s3] sm:$0xff]  ;;  %390 = vperm.xlu1 %1293, %v376_v17   ;;  %v377_v19 = vld [vmem:[%s2238_s3 + $0x18] sm:$0xff]  ;;  %v1235_v21 = vld [vmem:[%s2238_s3 + $0x28] sm:$0xff] }
   0xb   :  { %118 = vmatprep.mubr.bf16.mxu0 %v2241_v11  ;;  %380 = vperm.xlu0 %1292, %v374_v16   ;;  %v1234_v20 = vld [vmem:[%s2238_s3 + $0x20] sm:$0xff]  ;;  %v1236_v22 = vld [vmem:[%s2238_s3 + $0x30] sm:$0xff]  ;;  %v1237_v23 = vld [vmem:[%s2238_s3 + $0x38] sm:$0xff] }
   0xc   :  { %v1055_v24 = vld [vmem:[%s2239_s4] sm:$0xff]  ;;  %v1056_v25 = vld [vmem:[%s2239_s4 + $0x8] sm:$0xff]  ;;  %v1057_v26 = vld [vmem:[%s2239_s4 + $0x10] sm:$0xff] }
   0xd   :  { %v1058_v27 = vld [vmem:[%s2239_s4 + $0x18] sm:$0xff] }
   0xe   :  { %395 = vperm.xlu1 %1293, %v377_v19  }
   0xf   :  { %385 = vperm.xlu0 %1292, %v375_v18  }
  0x10   :  { %1263 = vmatmul.mubr.msk.bf16.gmra.mrb[4].mxu1 %vm53_vm3, %v1298_v13 }
  0x11   :  { %1266 = vmatprep.mubr.msk.bf16.mxu1 %vm1474_vm2, %v1472_v1 }
  0x12   :  { %1219 = vmatmul.mubr.msk.bf16.gmra.mrb[4].mxu0 %vm53_vm3, %v1298_v13  ;;  %732 = vperm.xlu1 %1293, %v1235_v21  }
  0x13   :  { %128 = vmatprep.mubr.bf16.mxu0 %v2241_v11  ;;  %727 = vperm.xlu0 %1292, %v1234_v20  }
  0x16   :  { %742 = vperm.xlu1 %1293, %v1237_v23  }
  0x17   :  { %737 = vperm.xlu0 %1292, %v1236_v22  }
  0x18   :  { %1267 = vmatmul.mubr.msk.bf16.gmra.mrb[8].mxu1 %vm53_vm3, %v1299_v14 }
  0x19   :  { %1274 = vmatprep.mubr.msk.bf16.mxu1 %vm408_vm4, %v1541_v15 }
  0x1a   :  { %1220 = vmatmul.mubr.msk.bf16.gmra.mrb[8].mxu0 %vm53_vm3, %v1299_v14  ;;  %1066 = vperm.xlu1 %1293, %v1056_v25  }
  0x1b   :  { %447 = vmatprep.mubr.bf16.mxu0 %v2241_v11  ;;  %1061 = vperm.xlu0 %1292, %v1055_v24  }
  0x1e   :  { %1076 = vperm.xlu1 %1293, %v1058_v27  }
  0x1f   :  { %1071 = vperm.xlu0 %1292, %v1057_v26  }
  0xdb   :  { %v1581_v28 = vpop.f32.mrb[0].mxu1 }
  0xdc   :  { %v198_v29 = vand.u32 2147483647, %v1581_v28  ;;  %v1260_v31 = vpop.f32.mrb[1].mxu1 }
  0xdd   :  { %v1584_v30 = vpop.f32.mrb[0].mxu0  ;;  %v1589_v34 = vpop.f32.mrb[2].mxu1 }
  0xde   :  { %v196_v32 = vand.u32 2147483647, %v1584_v30  ;;  %v1587_v33 = vpop.f32.mrb[1].mxu0  ;;  %v210_v35 = vmul.f32 -2.0, %v198_v29  ;;  %v201_v37 = vand.u32 2147483647, %v1589_v34 }
  0xdf   :  { %v197_v36 = vand.u32 2147483647, %v1587_v33  ;;  %v1595_v38 = vpop.f32.mrb[2].mxu0  ;;  %v1261_v42 = vpop.f32.mrb[3].mxu1 }
  0xe0   :  { %v208_v39 = vmul.f32 -2.0, %v196_v32  ;;  %v199_v40 = vand.u32 2147483647, %v1595_v38  ;;  %v1600_v41 = vpop.f32.mrb[3].mxu0  ;;  %v224_v43 = vmul.f32 1.442695, %v210_v35 }
  0xe1   :  { %v209_v44 = vmul.f32 -2.0, %v197_v36  ;;  %v213_v45 = vmul.f32 -2.0, %v201_v37  ;;  %v200_v46 = vand.u32 2147483647, %v1600_v41 }
  0xe2   :  { %v220_v47 = vmul.f32 1.442695, %v208_v39  ;;  %v211_v48 = vmul.f32 -2.0, %v199_v40  ;;  %1304 = vpow2.f32 %v224_v43 }
  0xe3   :  { %v222_v49 = vmul.f32 1.442695, %v209_v44  ;;  %v230_v50 = vmul.f32 1.442695, %v213_v45  ;;  %v212_v51 = vmul.f32 -2.0, %v200_v46  ;;  %v1611_v53 = vpop.f32.mrb[4].mxu1 }
  0xe4   :  { %1306 = vpow2.f32 %v220_v47  ;;  %v226_v52 = vmul.f32 1.442695, %v211_v48  ;;  %v204_v55 = vand.u32 2147483647, %v1611_v53  ;;  %v1264_v57 = vpop.f32.mrb[5].mxu1 }
  0xe5   :  { %1308 = vpow2.f32 %v222_v49  ;;  %v228_v54 = vmul.f32 1.442695, %v212_v51  ;;  %v1614_v56 = vpop.f32.mrb[4].mxu0  ;;  %v1618_v59 = vpop.f32.mrb[6].mxu1 }
  0xe6   :  { %1310 = vpow2.f32 %v230_v50  ;;  %v1616_v58 = vpop.f32.mrb[5].mxu0  ;;  %v216_v60 = vmul.f32 -2.0, %v204_v55  ;;  %v207_v61 = vand.u32 2147483647, %v1618_v59  ;;  %v1265_v0 = vpop.f32.mrb[7].mxu1  ;;  %v1301_v59 = vld [vmem:[%s2237_s2 + $0x8] sm:$0xff]  }
  0xe7   :  { %1312 = vpow2.f32 %v226_v52  ;;  %v1623_v62 = vpop.f32.mrb[6].mxu0  ;;  %v202_v10 = vand.u32 2147483647, %v1614_v56  ;;  %v203_v12 = vand.u32 2147483647, %v1616_v58 }
  0xe8   :  { %v1625_v63 = vpop.f32.mrb[7].mxu0  ;;  %1314 = vpow2.f32 %v228_v54  ;;  %v236_v1 = vmul.f32 1.442695, %v216_v60  ;;  %v219_v2 = vmul.f32 -2.0, %v207_v61  ;;  %v205_v7 = vand.u32 2147483647, %v1623_v62 }
  0xe9   :  { %v214_v20 = vmul.f32 -2.0, %v202_v10  ;;  %v215_v21 = vmul.f32 -2.0, %v203_v12  ;;  %v206_v22 = vand.u32 2147483647, %v1625_v63 }
  0xea   :  { %1316 = vpow2.f32 %v236_v1  ;;  %v242_v4 = vmul.f32 1.442695, %v219_v2  ;;  %v217_v18 = vmul.f32 -2.0, %v205_v7 }
  0xeb   :  { %v232_v39 = vmul.f32 1.442695, %v214_v20  ;;  %v234_v42 = vmul.f32 1.442695, %v215_v21  ;;  %v218_v43 = vmul.f32 -2.0, %v206_v22  ;;  %v1782_v58 = vpop.f32.mrb[8].mxu1 }
  0xec   :  { %v1305_v3 = vpop.eup %1304  ;;  %v238_v31 = vmul.f32 1.442695, %v217_v18  ;;  %v1268_v63 = vpop.f32.mrb[9].mxu1 }
  0xed   :  { %v262_v6 = vadd.f32 1.0, %v1305_v3  ;;  %v265_v24 = vmul.f32 -0.5, %v1305_v3  ;;  %v268_v44 = vand.u32 2147483647, %v1305_v3  ;;  %v240_v2 = vmul.f32 1.442695, %v218_v43 }
  0xee   :  { %v1307_v5 = vpop.eup %1306  ;;  %v1784_v56 = vpop.f32.mrb[8].mxu0 }
  0xef   :  { %v1630_v8 = vpop.eup %1308  ;;  %v244_v9 = vadd.f32 1.0, %v1307_v5  ;;  %1318 = vlog2.f32 %v262_v6  ;;  %v247_v26 = vmul.f32 -0.5, %v1307_v5  ;;  %v250_v45 = vand.u32 2147483647, %v1307_v5 }
  0xf0   :  { %v1311_v13 = vpop.eup %1310  ;;  %v253_v14 = vadd.f32 1.0, %v1630_v8  ;;  %1320 = vpow2.f32 %v242_v4  ;;  %v256_v47 = vmul.f32 -0.5, %v1630_v8  ;;  %v266_v48 = vadd.f32 1.0, %v265_v24 }
  0xf1   :  { %v1635_v16 = vpop.eup %1312  ;;  %v289_v17 = vadd.f32 1.0, %v1311_v13  ;;  %v292_v35 = vmul.f32 -0.5, %v1311_v13  ;;  %v248_v52 = vadd.f32 1.0, %v247_v26  ;;  %v259_v54 = vand.u32 2147483647, %v1630_v8 }
  0xf2   :  { %1322 = vlog2.f32 %v253_v14  ;;  %v1639_v19 = vpop.eup %1314  ;;  %v271_v23 = vadd.f32 1.0, %v1635_v16  ;;  %v274_v49 = vmul.f32 -0.5, %v1635_v16  ;;  %v295_v1 = vand.u32 2147483647, %v1311_v13 }
  0xf3   :  { %1324 = vlog2.f32 %v244_v9  ;;  %v280_v27 = vadd.f32 1.0, %v1639_v19  ;;  %v283_v57 = vmul.f32 -0.5, %v1639_v19  ;;  %v293_v0 = vadd.f32 1.0, %v292_v35 }
  0xf4   :  { %1326 = vlog2.f32 %v289_v17  ;;  %v1647_v25 = vpop.eup %1316  ;;  %vm1659_vm5 = vcmp.lt.f32.partialorder %v268_v44, 0.0004427343  ;;  %vm1663_vm6 = vcmp.lt.f32.partialorder %v250_v45, 0.0004427343  ;;  %v257_v14 = vadd.f32 1.0, %v256_v47 }
  0xf5   :  { %1328 = vlog2.f32 %v271_v23  ;;  %v316_v50 = vadd.f32 1.0, %v1647_v25  ;;  %v267_v20 = vmul.f32 %v1305_v3, %v266_v48  ;;  %v275_v21 = vadd.f32 1.0, %v274_v49 }
  0xf6   :  { %1330 = vlog2.f32 %v280_v27  ;;  %v249_v24 = vmul.f32 %v1307_v5, %v248_v52  ;;  %vm1667_vm7 = vcmp.lt.f32.partialorder %v259_v54, 0.0004427343  ;;  %v277_v27 = vand.u32 2147483647, %v1635_v16 }
  0xf7   :  { %1332 = vpow2.f32 %v238_v31  ;;  %v284_v31 = vadd.f32 1.0, %v283_v57  ;;  %v294_v43 = vmul.f32 %v1311_v13, %v293_v0  ;;  %vm1672_vm8 = vcmp.lt.f32.partialorder %v295_v1, 0.0004427343 }
  0xf8   :  { %1334 = vpow2.f32 %v234_v42  ;;  %v258_v45 = vmul.f32 %v1630_v8, %v257_v14  ;;  %v286_v5 = vand.u32 2147483647, %v1639_v19  ;;  %v276_v13 = vmul.f32 %v1635_v16, %v275_v21 }
  0xf9   :  { %v1319_v51 = vpop.eup %1318  ;;  %1336 = vpow2.f32 %v232_v39  ;;  %vm278_vm9 = vcmp.lt.f32.partialorder %v277_v27, 0.0004427343  ;;  %v285_v52 = vmul.f32 %v1639_v19, %v284_v31  ;;  %v319_v54 = vmul.f32 -0.5, %v1647_v25 }
  0xfa   :  { %v1657_v60 = vpop.eup %1320  ;;  %v264_v18 = vmul.f32 0.6931472, %v1319_v51  ;;  %1338 = vlog2.f32 %v316_v50  ;;  %vm287_vm10 = vcmp.lt.f32.partialorder %v286_v5, 0.0004427343 }
  0xfb   :  { %v343_v47 = vadd.f32 1.0, %v1657_v60  ;;  %v320_v9 = vadd.f32 1.0, %v319_v54 }
  0xfc   :  { %v1323_v4 = vpop.eup %1322  ;;  %v270_v48 = vsel %vm1659_vm5, %v267_v20, %v264_v18 }
  0xfd   :  { %v1325_v17 = vpop.eup %1324  ;;  %v255_v35 = vmul.f32 0.6931472, %v1323_v4  ;;  %1340 = vlog2.f32 %v343_v47  ;;  %v1696_v16 = vadd.f32 %v270_v48, %v198_v29  ;;  %v321_v21 = vmul.f32 %v1647_v25, %v320_v9 }
  0xfe   :  { %v1327_v23 = vpop.eup %1326  ;;  %v246_v3 = vmul.f32 0.6931472, %v1325_v17  ;;  %1342 = vpow2.f32 %v240_v2 }
  0xff   :  { %v291_v42 = vmul.f32 0.6931472, %v1327_v23  ;;  %v1329_v39 = vpop.eup %1328  ;;  %v261_v8 = vsel %vm1667_vm7, %v258_v45, %v255_v35  ;;  %v349_v23 = vand.u32 2147483647, %v1657_v60 }
 0x100   :  { %v273_v50 = vmul.f32 0.6931472, %v1329_v39  ;;  %v1331_v51 = vpop.eup %1330  ;;  %v252_v19 = vsel %vm1663_vm6, %v249_v24, %v246_v3  ;;  %v1711_v28 = vadd.f32 %v261_v8, %v197_v36 }
 0x101   :  { %v297_v49 = vsel %vm1672_vm8, %v294_v43, %v291_v42  ;;  %v282_v1 = vmul.f32 0.6931472, %v1331_v51  ;;  %v1692_v4 = vpop.eup %1332  ;;  %v1719_v38 = vadd.f32 %v252_v19, %v196_v32  ;;  %vm350_vm12 = vcmp.lt.f32.partialorder %v349_v23, 0.0004427343 }
 0x102   :  { %v1690_v57 = vadd.f32 %v297_v49, %v201_v37  ;;  %v279_v0 = vsel %vm278_vm9, %v276_v13, %v273_v50  ;;  %v1700_v6 = vpop.eup %1334  ;;  %v346_v37 = vmul.f32 -0.5, %v1657_v60  ;;  %v325_v2 = vadd.f32 1.0, %v1692_v4 }
 0x103   :  { %v1704_v14 = vadd.f32 %v279_v0, %v199_v40  ;;  %v288_v34 = vsel %vm287_vm10, %v285_v52, %v282_v1  ;;  %v1707_v17 = vpop.eup %1336  ;;  %v322_v40 = vand.u32 2147483647, %v1647_v25  ;;  %v307_v33 = vadd.f32 1.0, %v1700_v6 }
 0x104   :  { %v1715_v29 = vadd.f32 %v288_v34, %v200_v46  ;;  %v1339_v18 = vpop.eup %1338  ;;  %v370_v20 = vpack.c.bf16 %v1690_v57, %v1696_v16  ;;  %v298_v46 = vadd.f32 1.0, %v1707_v17  ;;  %v347_v30 = vadd.f32 1.0, %v346_v37 }
 0x105   :  { %v368_v41 = vpack.c.bf16 %v1704_v14, %v1719_v38  ;;  %v318_v32 = vmul.f32 0.6931472, %v1339_v18  ;;  %vm323_vm11 = vcmp.lt.f32.partialorder %v322_v40, 0.0004427343  ;;  %1344 = vlog2.f32 %v325_v2 }
 0x106   :  { %v369_v36 = vpack.c.bf16 %v1715_v29, %v1711_v28  ;;  %1270 = vmatprep.subr.bf16.mxu1 %v370_v20  ;;  %1346 = vlog2.f32 %v307_v33  ;;  %v348_v27 = vmul.f32 %v1657_v60, %v347_v30  ;;  %v328_v39 = vmul.f32 -0.5, %v1692_v4 }
 0x107   :  { %1271 = vmatpush3.bf16.msra.mxu1 %v370_v20  ;;  %v1341_v24 = vpop.eup %1340  ;;  %1348 = vlog2.f32 %v298_v46  ;;  %v324_v31 = vsel %vm323_vm11, %v321_v21, %v318_v32  ;;  %v310_v3 = vmul.f32 -0.5, %v1700_v6  ;;  %v301_v45 = vmul.f32 -0.5, %v1707_v17  ;;  %v1801_v32 = vpop.permute.xlu1 %390 }
 0x108   :  { %415 = vmatprep.subr.bf16.mxu0 %v369_v36  ;;  %v345_v26 = vmul.f32 0.6931472, %v1341_v24  ;;  %v1343_v35 = vpop.eup %1342  ;;  %v1740_v44 = vadd.f32 %v324_v31, %v204_v55  ;;  %v329_v55 = vadd.f32 1.0, %v328_v39  ;;  %v331_v49 = vand.u32 2147483647, %v1692_v4  ;;  %v381_v21 = vpop.permute.xlu0 %380 }
 0x109   :  { %416 = vmatpush1.bf16.msra.mxu0 %v368_v41  ;;  %v334_v43 = vadd.f32 1.0, %v1343_v35  ;;  %v337_v47 = vmul.f32 -0.5, %v1343_v35  ;;  %v311_v48 = vadd.f32 1.0, %v310_v3  ;;  %v302_v50 = vadd.f32 1.0, %v301_v45 }
 0x10a   :  { %v351_v42 = vsel %vm350_vm12, %v348_v27, %v345_v26  ;;  %v313_v13 = vand.u32 2147483647, %v1700_v6  ;;  %v304_v52 = vand.u32 2147483647, %v1707_v17  ;;  %v330_v1 = vmul.f32 %v1692_v4, %v329_v55 }
 0x10b   :  { %v1736_v25 = vadd.f32 %v351_v42, %v207_v61  ;;  %1350 = vlog2.f32 %v334_v43  ;;  %v338_v8 = vadd.f32 1.0, %v337_v47  ;;  %v340_v19 = vand.u32 2147483647, %v1343_v35  ;;  %v1808_v31 = vpop.permute.xlu1 %395 }
 0x10c   :  { %v312_v34 = vmul.f32 %v1700_v6, %v311_v48  ;;  %vm332_vm13 = vcmp.lt.f32.partialorder %v331_v49, 0.0004427343  ;;  %v303_v9 = vmul.f32 %v1707_v17, %v302_v50  ;;  %vm314_vm14 = vcmp.lt.f32.partialorder %v313_v13, 0.0004427343  ;;  %v386_v42 = vpop.permute.xlu0 %385 }
 0x10d   :  { %v373_v60 = vpack.c.bf16 %v1736_v25, %v1740_v44  ;;  %vm305_vm15 = vcmp.lt.f32.partialorder %v304_v52, 0.0004427343  ;;  %v339_v20 = vmul.f32 %v1343_v35, %v338_v8  ;;  %vm341_vm0 = vcmp.lt.f32.partialorder %v340_v19, 0.0004427343 }
 0x10f   :  { %v1345_v5 = vpop.eup %1344  ;;  %1272 = vmatprep.subr.bf16.mxu1 %v373_v60 }
 0x110   :  { %v1347_v53 = vpop.eup %1346  ;;  %1273 = vmatpush3.bf16.msra.mxu1 %v373_v60  ;;  %v327_v51 = vmul.f32 0.6931472, %v1345_v5 }
 0x111   :  { %v1349_v61 = vpop.eup %1348  ;;  %v309_v54 = vmul.f32 0.6931472, %v1347_v53 }
 0x112   :  { %v300_v0 = vmul.f32 0.6931472, %v1349_v61  ;;  %v333_v18 = vsel %vm332_vm13, %v330_v1, %v327_v51 }
 0x113   :  { %1275 = vmatmul.mubr.msk.bf16.vlgmr.msra.gmra.mrb[12].mxu1 %vm408_vm4, %v1301_v59  ;;  %v315_v40 = vsel %vm314_vm14, %v312_v34, %v309_v54  ;;  %v1760_v4 = vadd.f32 %v333_v18, %v205_v7  ;;  %v1786_v7 = vpop.f32.mrb[9].mxu0 }
 0x114   :  { %793 = vmatprep.mubr.bf16.mxu1 %v2241_v11  ;;  %v306_v33 = vsel %vm305_vm15, %v303_v9, %v300_v0  ;;  %v1764_v6 = vadd.f32 %v315_v40, %v203_v12  ;;  %v1790_v12 = vpop.f32.mrb[10].mxu0 }
 0x115   :  { %v1351_v37 = vpop.eup %1350  ;;  %v1772_v41 = vadd.f32 %v306_v33, %v202_v10  ;;  %v1788_v10 = vpop.f32.mrb[10].mxu1 }
 0x116   :  { %v336_v2 = vmul.f32 0.6931472, %v1351_v37  ;;  %v1792_v30 = vpop.f32.mrb[11].mxu0 }
 0x117   :  { %v371_v62 = vpack.c.bf16 %v1760_v4, %v1772_v41 }
 0x118   :  { %v342_v36 = vsel %vm341_vm0, %v339_v20, %v336_v2 }
 0x119   :  { %v1768_v17 = vadd.f32 %v342_v36, %v206_v22  ;;  %v1269_v22 = vpop.f32.mrb[11].mxu1 }
 0x11b   :  { %v372_v46 = vpack.c.bf16 %v1768_v17, %v1764_v6 }
 0x11d   :  { %417 = vmatprep.subr.bf16.mxu0 %v372_v46 }
 0x11e   :  { %418 = vmatpush1.bf16.msra.mxu0 %v371_v62 }
 0x121   :  { %1226 = vmatmul.mubr.msk.bf16.vlgmr.msra.gmra.mrb[12].mxu0 %vm408_vm4, %v1541_v15  ;;  %v1797_v15 = vld [vmem:[%s2237_s2 + $0x10] sm:$0xff]  }
 0x122   :  { %457 = vmatprep.mubr.bf16.mxu0 %v2241_v11 }
 0x129   :  { %1227 = vmatmul.mubr.msk.bf16.gmra.mrb[16].mxu0 %vm408_vm4, %v1301_v59 }
 0x12a   :  { %1282 = vmatprep.mubr.msk.bf16.mxu0 %vm408_vm4, %v1797_v15 }
 0x1e6   :  { %v1276_v23 = vpop.f32.mrb[12].mxu1 }
 0x1e7   :  { %v1804_v24 = vadd.f32 %v1276_v23, %v1801_v32  ;;  %v502_v26 = vpop.f32.mrb[13].mxu1 }
 0x1e8   :  { %v1806_v27 = vadd.f32 %v502_v26, %v381_v21  ;;  %v1277_v35 = vpop.f32.mrb[14].mxu1 }
 0x1e9   :  { %v525_v43 = vand.u32 2147483647, %v1804_v24  ;;  %v1812_v39 = vadd.f32 %v1277_v35, %v1808_v31  ;;  %v505_v3 = vpop.f32.mrb[15].mxu1 }
 0x1ea   :  { %v519_v60 = vand.u32 2147483647, %v1806_v27  ;;  %v1815_v45 = vadd.f32 %v505_v3, %v386_v42 }
 0x1eb   :  { %v537_v5 = vmul.f32 -2.0, %v525_v43  ;;  %v528_v47 = vand.u32 2147483647, %v1812_v39 }
 0x1ec   :  { %v531_v59 = vmul.f32 -2.0, %v519_v60  ;;  %v522_v53 = vand.u32 2147483647, %v1815_v45 }
 0x1ed   :  { %v557_v55 = vmul.f32 1.442695, %v537_v5  ;;  %v540_v61 = vmul.f32 -2.0, %v528_v47 }
 0x1ee   :  { %v545_v48 = vmul.f32 1.442695, %v531_v59  ;;  %v534_v49 = vmul.f32 -2.0, %v522_v53 }
 0x1ef   :  { %1352 = vpow2.f32 %v557_v55  ;;  %v563_v50 = vmul.f32 1.442695, %v540_v61 }
 0x1f0   :  { %1354 = vpow2.f32 %v545_v48  ;;  %v551_v13 = vmul.f32 1.442695, %v534_v49 }
 0x1f1   :  { %1356 = vpow2.f32 %v563_v50 }
 0x1f2   :  { %1358 = vpow2.f32 %v551_v13 }
 0x1f4   :  { %v449_v51 = vpop.f32.mrb[12].mxu0 }
 0x1f5   :  { %v1827_v52 = vadd.f32 %v449_v51, %v381_v21  ;;  %v451_v54 = vpop.f32.mrb[13].mxu0 }
 0x1f6   :  { %v1829_v8 = vadd.f32 %v451_v54, %v381_v21  ;;  %v453_v0 = vpop.f32.mrb[14].mxu0 }
 0x1f7   :  { %v2245_v1 = vand.u32 2147483647, %v1827_v52  ;;  %v455_v19 = vpop.f32.mrb[15].mxu0  ;;  %v1839_v63 = vadd.f32 %v453_v0, %v386_v42 }
 0x1f8   :  { %v2246_v37 = vand.u32 2147483647, %v1829_v8  ;;  %v1841_v22 = vadd.f32 %v455_v19, %v386_v42 }
 0x1f9   :  { %v1353_v34 = vpop.eup %1352  ;;  %v529_v40 = vmul.f32 -2.0, %v2245_v1  ;;  %v2244_v61 = vand.u32 2147483647, %v1839_v63 }
 0x1fa   :  { %v1355_v9 = vpop.eup %1354  ;;  %v637_v18 = vadd.f32 1.0, %v1353_v34  ;;  %v530_v33 = vmul.f32 -2.0, %v2246_v37  ;;  %v640_v5 = vmul.f32 -0.5, %v1353_v34  ;;  %v2243_v48 = vand.u32 2147483647, %v1841_v22 }
 0x1fb   :  { %v1357_v2 = vpop.eup %1356  ;;  %v583_v20 = vadd.f32 1.0, %v1355_v9  ;;  %v541_v46 = vmul.f32 1.442695, %v529_v40  ;;  %v586_v59 = vmul.f32 -0.5, %v1355_v9  ;;  %v643_v50 = vand.u32 2147483647, %v1353_v34 }
 0x1fc   :  { %v1837_v36 = vpop.eup %1358  ;;  %1360 = vlog2.f32 %v637_v18  ;;  %v664_v62 = vadd.f32 1.0, %v1357_v2  ;;  %v459_v21 = vpop.f32.mrb[16].mxu0  ;;  %v543_v26 = vmul.f32 1.442695, %v530_v33  ;;  %v667_v55 = vmul.f32 -0.5, %v1357_v2 }
 0x1fd   :  { %1362 = vlog2.f32 %v583_v20  ;;  %v461_v23 = vpop.f32.mrb[17].mxu0  ;;  %v610_v35 = vadd.f32 1.0, %v1837_v36  ;;  %v1847_v49 = vadd.f32 %v459_v21, %v1801_v32  ;;  %v589_v13 = vand.u32 2147483647, %v1355_v9 }
 0x1fe   :  { %1364 = vpow2.f32 %v541_v46  ;;  %v463_v3 = vpop.f32.mrb[18].mxu0  ;;  %v532_v51 = vmul.f32 -2.0, %v2244_v61  ;;  %v533_v54 = vmul.f32 -2.0, %v2243_v48  ;;  %v1855_v19 = vadd.f32 %v461_v23, %v1801_v32 }
 0x1ff   :  { %1366 = vlog2.f32 %v664_v62  ;;  %v465_v42 = vpop.f32.mrb[19].mxu0  ;;  %v2242_v0 = vand.u32 2147483647, %v1847_v49  ;;  %v641_v18 = vadd.f32 1.0, %v640_v5  ;;  %v587_v40 = vadd.f32 1.0, %v586_v59 }
 0x200   :  { %1368 = vpow2.f32 %v543_v26  ;;  %v670_v20 = vand.u32 2147483647, %v1357_v2  ;;  %v1858_v33 = vadd.f32 %v463_v3, %v1808_v31  ;;  %v668_v46 = vadd.f32 1.0, %v667_v55 }
 0x201   :  { %1370 = vlog2.f32 %v610_v35  ;;  %v547_v62 = vmul.f32 1.442695, %v532_v51  ;;  %v549_v21 = vmul.f32 1.442695, %v533_v54  ;;  %v535_v26 = vmul.f32 -2.0, %v2242_v0 }
 0x202   :  { %vm1862_vm1 = vcmp.lt.f32.partialorder %v643_v50, 0.0004427343  ;;  %vm1866_vm2 = vcmp.lt.f32.partialorder %v589_v13, 0.0004427343  ;;  %v613_v23 = vmul.f32 -0.5, %v1837_v36  ;;  %v1872_v3 = vadd.f32 %v465_v42, %v1808_v31 }
 0x203   :  { %1372 = vpow2.f32 %v547_v62  ;;  %v553_v55 = vmul.f32 1.442695, %v535_v26  ;;  %v524_v51 = vand.u32 2147483647, %v1855_v19  ;;  %v588_v0 = vmul.f32 %v1355_v9, %v587_v40 }
 0x204   :  { %1374 = vpow2.f32 %v549_v21  ;;  %v526_v13 = vand.u32 2147483647, %v1858_v33  ;;  %v642_v61 = vmul.f32 %v1353_v34, %v641_v18  ;;  %v669_v37 = vmul.f32 %v1357_v2, %v668_v46 }
 0x205   :  { %vm1879_vm3 = vcmp.lt.f32.partialorder %v670_v20, 0.0004427343  ;;  %v614_v26 = vadd.f32 1.0, %v613_v23  ;;  %1376 = vpow2.f32 %v553_v55  ;;  %v616_v40 = vand.u32 2147483647, %v1837_v36 }
 0x206   :  { %v1361_v35 = vpop.eup %1360  ;;  %v536_v34 = vmul.f32 -2.0, %v524_v51  ;;  %v527_v2 = vand.u32 2147483647, %v1872_v3 }
 0x207   :  { %v1363_v5 = vpop.eup %1362  ;;  %v639_v59 = vmul.f32 0.6931472, %v1361_v35  ;;  %vm617_vm5 = vcmp.lt.f32.partialorder %v616_v40, 0.0004427343 }
 0x208   :  { %v1875_v54 = vpop.eup %1364  ;;  %v585_v50 = vmul.f32 0.6931472, %v1363_v5  ;;  %v555_v32 = vmul.f32 1.442695, %v536_v34  ;;  %v539_v27 = vmul.f32 -2.0, %v527_v2 }
 0x209   :  { %v1367_v48 = vpop.eup %1366  ;;  %v565_v1 = vadd.f32 1.0, %v1875_v54  ;;  %v645_v9 = vsel %vm1862_vm1, %v642_v61, %v639_v59 }
 0x20a   :  { %v591_v42 = vsel %vm1866_vm2, %v588_v0, %v585_v50  ;;  %v666_v62 = vmul.f32 0.6931472, %v1367_v48  ;;  %v1369_v35 = vpop.eup %1368  ;;  %v538_v48 = vmul.f32 -2.0, %v526_v13  ;;  %v681_v46 = vadd.f32 %v645_v9, %v525_v43 }
 0x20b   :  { %v1371_v18 = vpop.eup %1370  ;;  %1378 = vlog2.f32 %v565_v1  ;;  %v574_v0 = vadd.f32 1.0, %v1369_v35  ;;  %v675_v11 = vadd.f32 %v591_v42, %v519_v60  ;;  %v615_v1 = vmul.f32 %v1837_v36, %v614_v26 }
 0x20c   :  { %v672_v20 = vsel %vm1879_vm3, %v669_v37, %v666_v62  ;;  %v612_v21 = vmul.f32 0.6931472, %v1371_v18  ;;  %v568_v37 = vmul.f32 -0.5, %v1875_v54  ;;  %v559_v5 = vmul.f32 1.442695, %v538_v48 }
 0x20d   :  { %v684_v61 = vadd.f32 %v672_v20, %v528_v47  ;;  %1380 = vlog2.f32 %v574_v0  ;;  %v1373_v60 = vpop.eup %1372  ;;  %v687_v59 = vmul.f32 0.5, %v675_v11  ;;  %v693_v47 = vmul.f32 0.5, %v681_v46 }
 0x20e   :  { %v618_v23 = vsel %vm617_vm5, %v615_v1, %v612_v21  ;;  %1382 = vpow2.f32 %v555_v32  ;;  %v1907_v43 = vpop.eup %1374  ;;  %v577_v36 = vmul.f32 -0.5, %v1369_v35  ;;  %v592_v55 = vadd.f32 1.0, %v1373_v60 }
 0x20f   :  { %v696_v39 = vmul.f32 0.5, %v684_v61  ;;  %v678_v24 = vadd.f32 %v618_v23, %v522_v53  ;;  %1384 = vpow2.f32 %v559_v5  ;;  %v601_v31 = vadd.f32 1.0, %v1907_v43  ;;  %v1910_v42 = vpop.eup %1376 }
 0x210   :  { %v571_v62 = vand.u32 2147483647, %v1875_v54  ;;  %1386 = vlog2.f32 %v592_v55  ;;  %v561_v26 = vmul.f32 1.442695, %v539_v27  ;;  %v1914_v9 = vadd.f32 %v687_v59, %v1696_v16  ;;  %v1951_v55 = vld [vmem:[%s2237_s2 + $0x18] sm:$0xff]   ;;  %s1477_s2 = smov [#allocation2]  }
 0x211   :  { %v690_v50 = vmul.f32 0.5, %v678_v24  ;;  %v1917_v45 = vadd.f32 %v696_v39, %v1736_v25  ;;  %1388 = vlog2.f32 %v601_v31  ;;  %v1923_v34 = vadd.f32 %v693_v47, %v1740_v44  ;;  %s1204_s30 = sshll.u32 %s1477_s2, 4  ;;  %s1205_s30 = int_to_ptr.vmem [resolvable:$true] %s1204_s30 }
 0x212   :  { %v569_v18 = vadd.f32 1.0, %v568_v37  ;;  %v578_v20 = vadd.f32 1.0, %v577_v36  ;;  %v580_v0 = vand.u32 2147483647, %v1369_v35  ;;  %v595_v48 = vmul.f32 -0.5, %v1373_v60  ;;  %s1448_s1 = scalar_lea.vmem %s1205_s30, 48  ;;  %p1453_p1 = scmp.lt.s32.totalorder %s1205_s30, %s1205_s30 }
 0x213   :  { %v1920_v53 = vadd.f32 %v690_v50, %v1690_v57  ;;  %v619_v11 = vadd.f32 1.0, %v1910_v42  ;;  %1390 = vpow2.f32 %v561_v26  ;;  %v604_v61 = vmul.f32 -0.5, %v1907_v43  ;;  %p1449_p0 = scmp.ne.s32.totalorder %s1205_s30, %s1448_s1  ;;  %s1452_s6 = scalar_lea.vmem %s1205_s30, 64 }
 0x214   :  { %v719_v44 = vpack.c.bf16 %v1917_v45, %v1923_v34  ;;  %vm1931_vm6 = vcmp.lt.f32.partialorder %v571_v62, 0.0004427343  ;;  %v579_v1 = vmul.f32 %v1369_v35, %v578_v20  ;;  %v570_v37 = vmul.f32 %v1875_v54, %v569_v18  ;;  %p1454_p2 = scmp.lt.s32.totalorder %s1452_s6, %s1448_s1 }
 0x215   :  { %v1379_v40 = vpop.eup %1378  ;;  %v716_v16 = vpack.c.bf16 %v1920_v53, %v1914_v9  ;;  %vm1936_vm7 = vcmp.lt.f32.partialorder %v580_v0, 0.0004427343  ;;  %v596_v5 = vadd.f32 1.0, %v595_v48  ;;  %1392 = vlog2.f32 %v619_v11 }
 0x216   :  { %v567_v57 = vmul.f32 0.6931472, %v1379_v40  ;;  %v598_v39 = vand.u32 2147483647, %v1373_v60  ;;  %v605_v24 = vadd.f32 1.0, %v604_v61  ;;  %v622_v61 = vmul.f32 -0.5, %v1910_v42  ;;  %p1455_p3 = por %p1454_p2, %p1453_p1 }
 0x217   :  { %v1381_v25 = vpop.eup %1380  ;;  %1278 = vmatprep.subr.bf16.mxu0 %v716_v16  ;;  %v607_v54 = vand.u32 2147483647, %v1907_v43  ;;  %v2265_v62 = vand.u32 2147483647, %v1829_v8  ;;  %v597_v18 = vmul.f32 %v1373_v60, %v596_v5  ;;  %v2266_v20 = vand.u32 2147483647, %v1827_v52 }
 0x218   :  { %v576_v46 = vmul.f32 0.6931472, %v1381_v25  ;;  %1279 = vmatpush3.bf16.msra.mxu0 %v716_v16  ;;  %v1383_v32 = vpop.eup %1382  ;;  %v573_v35 = vsel %vm1931_vm6, %v570_v37, %v567_v57  ;;  %vm599_vm8 = vcmp.lt.f32.partialorder %v598_v39, 0.0004427343  ;;  %v606_v11 = vmul.f32 %v1907_v43, %v605_v24  ;;  %p1456_p4 = pnand %p1455_p3, %p1449_p0 }
 0x219   :  { %1280 = vmatprep.subr.bf16.mxu0 %v719_v44  ;;  %v1940_v27 = vpop.eup %1384  ;;  %v628_v47 = vadd.f32 1.0, %v1383_v32  ;;  %v673_v0 = vadd.f32 %v573_v35, %v2266_v20  ;;  %vm608_vm9 = vcmp.lt.f32.partialorder %v607_v54, 0.0004427343  ;;  %v631_v57 = vmul.f32 -0.5, %v1383_v32 }
 0x21a   :  { %v582_v59 = vsel %vm1936_vm7, %v579_v1, %v576_v46  ;;  %v646_v36 = vadd.f32 1.0, %v1940_v27  ;;  %v1387_v50 = vpop.eup %1386  ;;  %v2267_v8 = vand.u32 2147483647, %v1839_v63  ;;  %v649_v52 = vmul.f32 -0.5, %v1940_v27 }
 0x21b   :  { %1394 = vlog2.f32 %v628_v47  ;;  %v1389_v31 = vpop.eup %1388  ;;  %v674_v26 = vadd.f32 %v582_v59, %v2265_v62  ;;  %v594_v40 = vmul.f32 0.6931472, %v1387_v50  ;;  %v2268_v1 = vand.u32 2147483647, %v1841_v22 }
 0x21c   :  { %1281 = vmatpush3.bf16.msra.mxu0 %v719_v44  ;;  %1396 = vlog2.f32 %v646_v36  ;;  %v603_v48 = vmul.f32 0.6931472, %v1389_v31  ;;  %v685_v37 = vmul.f32 0.5, %v673_v0  ;;  %v623_v39 = vadd.f32 1.0, %v622_v61 }
 0x21d   :  { %v1391_v16 = vpop.eup %1390  ;;  %v600_v25 = vsel %vm599_vm8, %v597_v18, %v594_v40  ;;  %v686_v21 = vmul.f32 0.5, %v674_v26  ;;  %v632_v24 = vadd.f32 1.0, %v631_v57  ;;  %v625_v63 = vand.u32 2147483647, %v1910_v42 }
 0x21e   :  { %v676_v60 = vadd.f32 %v600_v25, %v2267_v8  ;;  %v609_v46 = vsel %vm608_vm9, %v606_v11, %v603_v48  ;;  %v655_v44 = vadd.f32 1.0, %v1391_v16  ;;  %v634_v35 = vand.u32 2147483647, %v1383_v32 }
 0x21f   :  { %1283 = vmatmul.mubr.msk.bf16.vlgmr.msra.gmra.mrb[20].mxu0 %vm408_vm4, %v1951_v55  ;;  %v677_v43 = vadd.f32 %v609_v46, %v2268_v1  ;;  %v1393_v5 = vpop.eup %1392  ;;  %v650_v54 = vadd.f32 1.0, %v649_v52  ;;  %v1971_v36 = vadd.f32 %v686_v21, %v1711_v28  ;;  %v652_v50 = vand.u32 2147483647, %v1940_v27 }
 0x220   :  { %v688_v23 = vmul.f32 0.5, %v676_v60  ;;  %1398 = vlog2.f32 %v655_v44  ;;  %v658_v31 = vmul.f32 -0.5, %v1391_v16  ;;  %v1978_v26 = vadd.f32 %v685_v37, %v1719_v38 }
 0x221   :  { %v689_v59 = vmul.f32 0.5, %v677_v43  ;;  %v621_v40 = vmul.f32 0.6931472, %v1393_v5  ;;  %v624_v18 = vmul.f32 %v1910_v42, %v623_v39  ;;  %v633_v0 = vmul.f32 %v1383_v32, %v632_v24 }
 0x222   :  { %v1967_v47 = vadd.f32 %v688_v23, %v1704_v14  ;;  %vm635_vm10 = vcmp.lt.f32.partialorder %v634_v35, 0.0004427343  ;;  %vm626_vm11 = vcmp.lt.f32.partialorder %v625_v63, 0.0004427343  ;;  %vm653_vm12 = vcmp.lt.f32.partialorder %v652_v50, 0.0004427343 }
 0x223   :  { %v1974_v22 = vadd.f32 %v689_v59, %v1715_v29  ;;  %v651_v29 = vmul.f32 %v1940_v27, %v650_v54  ;;  %v659_v38 = vadd.f32 1.0, %v658_v31  ;;  %v627_v61 = vsel %vm626_vm11, %v624_v18, %v621_v40 }
 0x224   :  { %v714_v11 = vpack.c.bf16 %v1967_v47, %v1978_v26  ;;  %v661_v42 = vand.u32 2147483647, %v1391_v16  ;;  %v2269_v27 = vand.u32 2147483647, %v1847_v49 }
 0x225   :  { %v1395_v62 = vpop.eup %1394  ;;  %v715_v28 = vpack.c.bf16 %v1974_v22, %v1971_v36  ;;  %v660_v44 = vmul.f32 %v1391_v16, %v659_v38 }
 0x226   :  { %v1397_v14 = vpop.eup %1396  ;;  %v630_v20 = vmul.f32 0.6931472, %v1395_v62  ;;  %v679_v46 = vadd.f32 %v627_v61, %v2269_v27  ;;  %vm662_vm13 = vcmp.lt.f32.partialorder %v661_v42, 0.0004427343 }
 0x227   :  { %v648_v48 = vmul.f32 0.6931472, %v1397_v14  ;;  %761 = vmatprep.subr.bf16.mxu1 %v715_v28 }
 0x228   :  { %v636_v25 = vsel %vm635_vm10, %v633_v0, %v630_v20  ;;  %762 = vmatpush1.bf16.msra.mxu1 %v714_v11  ;;  %v691_v23 = vmul.f32 0.5, %v679_v46 }
 0x229   :  { %v654_v57 = vsel %vm653_vm12, %v651_v29, %v648_v48  ;;  %v680_v60 = vadd.f32 %v636_v25, %v524_v51 }
 0x22a   :  { %v682_v32 = vadd.f32 %v654_v57, %v526_v13  ;;  %v1399_v8 = vpop.eup %1398  ;;  %v2004_v51 = vadd.f32 %v691_v23, %v1772_v41 }
 0x22b   :  { %v657_v52 = vmul.f32 0.6931472, %v1399_v8  ;;  %v692_v43 = vmul.f32 0.5, %v680_v60 }
 0x22c   :  { %v694_v21 = vmul.f32 0.5, %v682_v32 }
 0x22d   :  { %v663_v1 = vsel %vm662_vm13, %v660_v44, %v657_v52  ;;  %v1998_v19 = vadd.f32 %v692_v43, %v1764_v6  ;;  %v728_v6 = vpop.permute.xlu0 %727 }
 0x22e   :  { %v683_v37 = vadd.f32 %v663_v1, %v527_v2  ;;  %v1995_v33 = vadd.f32 %v694_v21, %v1760_v4  ;;  %v2270_v4 = vmov 0  }
 0x230   :  { %v695_v5 = vmul.f32 0.5, %v683_v37  ;;  %v717_v3 = vpack.c.bf16 %v1995_v33, %v2004_v51 }
 0x231   :  { %v2017_v41 = vpop.permute.xlu0 %737 }
 0x232   :  { %v2001_v49 = vadd.f32 %v695_v5, %v1768_v17  ;;  %v2015_v17 = vpop.permute.xlu1 %732 }
 0x234   :  { %v718_v13 = vpack.c.bf16 %v2001_v49, %v1998_v19 }
 0x236   :  { %763 = vmatprep.subr.bf16.mxu1 %v718_v13  ;;  %v2022_v39 = vpop.permute.xlu1 %742  ;;  %v2046_v13 = vmul.f32 %v1782_v58, %v1782_v58 }
 0x237   :  { %764 = vmatpush1.bf16.msra.mxu1 %v717_v3 }
 0x23a   :  { %1240 = vmatmul.mubr.msk.bf16.vlgmr.msra.gmra.mrb[16].mxu1 %vm408_vm4, %v1797_v15 }
 0x23b   :  { %803 = vmatprep.mubr.bf16.mxu1 %v2270_v4 }
 0x242   :  { %1241 = vmatmul.mubr.msk.bf16.gmra.mrb[20].mxu1 %vm408_vm4, %v1951_v55 }
 0x2f2   :  { %v1284_v2 = vpop.f32.mrb[20].mxu0 }
 0x2f3   :  { %v2020_v16 = vadd.f32 %v1284_v2, %v2017_v41  ;;  %v848_v59 = vpop.f32.mrb[21].mxu0 }
 0x2f4   :  { %v2024_v24 = vadd.f32 %v848_v59, %v728_v6  ;;  %v1285_v15 = vpop.f32.mrb[22].mxu0 }
 0x2f5   :  { %v871_v63 = vand.u32 2147483647, %v2020_v16  ;;  %v2028_v35 = vadd.f32 %v1285_v15, %v2022_v39  ;;  %v851_v55 = vpop.f32.mrb[23].mxu0 }
 0x2f6   :  { %v865_v54 = vand.u32 2147483647, %v2024_v24  ;;  %v2032_v50 = vadd.f32 %v851_v55, %v2015_v17 }
 0x2f7   :  { %v883_v31 = vmul.f32 -2.0, %v871_v63  ;;  %v874_v62 = vand.u32 2147483647, %v2028_v35  ;;  %v1133_v35 = vrot.slane %v2046_v13, 4 }
 0x2f8   :  { %v877_v40 = vmul.f32 -2.0, %v865_v54  ;;  %v868_v14 = vand.u32 2147483647, %v2032_v50 }
 0x2f9   :  { %v903_v18 = vmul.f32 1.442695, %v883_v31  ;;  %v886_v20 = vmul.f32 -2.0, %v874_v62 }
 0x2fa   :  { %v891_v0 = vmul.f32 1.442695, %v877_v40  ;;  %v880_v28 = vmul.f32 -2.0, %v868_v14 }
 0x2fb   :  { %1400 = vpow2.f32 %v903_v18  ;;  %v909_v48 = vmul.f32 1.442695, %v886_v20 }
 0x2fc   :  { %1402 = vpow2.f32 %v891_v0  ;;  %v897_v29 = vmul.f32 1.442695, %v880_v28 }
 0x2fd   :  { %1404 = vpow2.f32 %v909_v48 }
 0x2fe   :  { %1406 = vpow2.f32 %v897_v29 }
 0x305   :  { %v1401_v11 = vpop.eup %1400 }
 0x306   :  { %v1403_v25 = vpop.eup %1402  ;;  %v983_v38 = vadd.f32 1.0, %v1401_v11  ;;  %v986_v8 = vmul.f32 -0.5, %v1401_v11  ;;  %v989_v52 = vand.u32 2147483647, %v1401_v11 }
 0x307   :  { %v1405_v61 = vpop.eup %1404  ;;  %v929_v57 = vadd.f32 1.0, %v1403_v25  ;;  %v932_v60 = vmul.f32 -0.5, %v1403_v25  ;;  %v935_v1 = vand.u32 2147483647, %v1403_v25 }
 0x308   :  { %v1407_v42 = vpop.eup %1406  ;;  %1408 = vlog2.f32 %v983_v38  ;;  %v1010_v32 = vadd.f32 1.0, %v1405_v61  ;;  %v1013_v46 = vmul.f32 -0.5, %v1405_v61  ;;  %v987_v21 = vadd.f32 1.0, %v986_v8 }
 0x309   :  { %1410 = vlog2.f32 %v929_v57  ;;  %v956_v27 = vadd.f32 1.0, %v1407_v42  ;;  %v959_v44 = vmul.f32 -0.5, %v1407_v42  ;;  %v933_v43 = vadd.f32 1.0, %v932_v60 }
 0x30a   :  { %1412 = vlog2.f32 %v1010_v32  ;;  %v1016_v37 = vand.u32 2147483647, %v1405_v61  ;;  %v1014_v23 = vadd.f32 1.0, %v1013_v46  ;;  %vm2048_vm4 = vcmp.lt.f32.partialorder %v989_v52, 0.0004427343 }
 0x30b   :  { %1414 = vlog2.f32 %v956_v27  ;;  %v960_v4 = vadd.f32 1.0, %v959_v44  ;;  %v988_v15 = vmul.f32 %v1401_v11, %v987_v21  ;;  %vm2054_vm14 = vcmp.lt.f32.partialorder %v935_v1, 0.0004427343 }
 0x30c   :  { %v962_v31 = vand.u32 2147483647, %v1407_v42  ;;  %v934_v58 = vmul.f32 %v1403_v25, %v933_v43  ;;  %vm2060_vm15 = vcmp.lt.f32.partialorder %v1016_v37, 0.0004427343  ;;  %v1015_v57 = vmul.f32 %v1405_v61, %v1014_v23 }
 0x30d   :  { %v795_v5 = vpop.f32.mrb[16].mxu1  ;;  %v961_v60 = vmul.f32 %v1407_v42, %v960_v4 }
 0x30e   :  { %v2052_v2 = vadd.f32 %v795_v5, %v728_v6  ;;  %v797_v59 = vpop.f32.mrb[17].mxu1  ;;  %vm963_vm0 = vcmp.lt.f32.partialorder %v962_v31, 0.0004427343 }
 0x30f   :  { %v2058_v40 = vadd.f32 %v797_v59, %v728_v6  ;;  %v799_v18 = vpop.f32.mrb[18].mxu1 }
 0x310   :  { %v863_v28 = vand.u32 2147483647, %v2052_v2  ;;  %v2066_v48 = vadd.f32 %v799_v18, %v2015_v17  ;;  %v801_v29 = vpop.f32.mrb[19].mxu1 }
 0x311   :  { %v864_v32 = vand.u32 2147483647, %v2058_v40  ;;  %v2070_v6 = vadd.f32 %v801_v29, %v2015_v17  ;;  %v1118_v40 = vmul.f32 %v1784_v56, %v1784_v56 }
 0x312   :  { %v1409_v20 = vpop.eup %1408  ;;  %v875_v27 = vmul.f32 -2.0, %v863_v28  ;;  %v866_v46 = vand.u32 2147483647, %v2066_v48 }
 0x313   :  { %v1411_v11 = vpop.eup %1410  ;;  %v985_v38 = vmul.f32 0.6931472, %v1409_v20  ;;  %v876_v61 = vmul.f32 -2.0, %v864_v32  ;;  %v867_v21 = vand.u32 2147483647, %v2070_v6 }
 0x314   :  { %v1413_v8 = vpop.eup %1412  ;;  %v931_v25 = vmul.f32 0.6931472, %v1411_v11  ;;  %v887_v43 = vmul.f32 1.442695, %v875_v27  ;;  %v878_v37 = vmul.f32 -2.0, %v866_v46 }
 0x315   :  { %v991_v52 = vsel %vm2048_vm4, %v988_v15, %v985_v38  ;;  %v1012_v44 = vmul.f32 0.6931472, %v1413_v8  ;;  %v1415_v1 = vpop.eup %1414  ;;  %v889_v4 = vmul.f32 1.442695, %v876_v61  ;;  %v805_v59 = vpop.f32.mrb[20].mxu1  ;;  %v879_v24 = vmul.f32 -2.0, %v867_v21 }
 0x316   :  { %v1027_v17 = vadd.f32 %v991_v52, %v871_v63  ;;  %v937_v42 = vsel %vm2054_vm14, %v934_v58, %v931_v25  ;;  %v958_v3 = vmul.f32 0.6931472, %v1415_v1  ;;  %1416 = vpow2.f32 %v887_v43  ;;  %v807_v15 = vpop.f32.mrb[21].mxu1 }
 0x317   :  { %v1021_v23 = vadd.f32 %v937_v42, %v865_v54  ;;  %v1018_v5 = vsel %vm2060_vm15, %v1015_v57, %v1012_v44  ;;  %v893_v63 = vmul.f32 1.442695, %v878_v37  ;;  %1418 = vpow2.f32 %v889_v4  ;;  %v809_v54 = vpop.f32.mrb[22].mxu1 }
 0x318   :  { %v1030_v16 = vadd.f32 %v1018_v5, %v874_v62  ;;  %v964_v18 = vsel %vm963_vm0, %v961_v60, %v958_v3  ;;  %v1039_v20 = vmul.f32 0.5, %v1027_v17  ;;  %v811_v0 = vpop.f32.mrb[23].mxu1  ;;  %v2097_v62 = vpop.permute.xlu0 %1061  ;;  %v895_v31 = vmul.f32 1.442695, %v879_v24 }
 0x319   :  { %v1033_v55 = vmul.f32 0.5, %v1021_v23  ;;  %v1024_v58 = vadd.f32 %v964_v18, %v868_v14  ;;  %1420 = vpow2.f32 %v893_v63  ;;  %v2100_v29 = vadd.f32 %v805_v59, %v2017_v41  ;;  %v2109_v14 = vpop.permute.xlu1 %1066 }
 0x31a   :  { %v2103_v11 = vadd.f32 %v807_v15, %v2017_v41  ;;  %v1042_v57 = vmul.f32 0.5, %v1030_v16  ;;  %v2107_v50 = vadd.f32 %v809_v54, %v2022_v39  ;;  %1422 = vpow2.f32 %v895_v31 }
 0x31b   :  { %v1045_v38 = vadd.f32 %v1033_v55, %v1914_v9  ;;  %v1036_v8 = vmul.f32 0.5, %v1024_v58  ;;  %v869_v25 = vand.u32 2147483647, %v2100_v29  ;;  %v1051_v27 = vadd.f32 %v1039_v20, %v1923_v34 }
 0x31c   :  { %v870_v60 = vand.u32 2147483647, %v2103_v11  ;;  %v2116_v41 = vadd.f32 %v811_v0, %v2022_v39  ;;  %v1134_v9 = vadd.f32 %v1133_v35, %v2046_v13  ;;  %v872_v61 = vand.u32 2147483647, %v2107_v50  ;;  %v2126_v43 = vpop.permute.xlu0 %1071 }
 0x31d   :  { %v1048_v52 = vadd.f32 %v1036_v8, %v1920_v53  ;;  %v881_v44 = vmul.f32 -2.0, %v869_v25  ;;  %v1081_v1 = vmul.f32 %v2097_v62, %v1045_v38  ;;  %v1054_v17 = vadd.f32 %v1042_v57, %v1917_v45  ;;  %v2132_v59 = vpop.permute.xlu1 %1076 }
 0x31e   :  { %v1154_v34 = vrot.slane %v1788_v10, 4  ;;  %v882_v39 = vmul.f32 -2.0, %v870_v60  ;;  %v1087_v37 = vmul.f32 %v2126_v43, %v1051_v27  ;;  %v873_v5 = vand.u32 2147483647, %v2116_v41 }
 0x31f   :  { %v1084_v42 = vmul.f32 %v2109_v14, %v1048_v52  ;;  %v899_v53 = vmul.f32 1.442695, %v881_v44  ;;  %v1135_v4 = vrot.slane %v1134_v9, 2  ;;  %v884_v16 = vmul.f32 -2.0, %v872_v61 }
 0x320   :  { %v1417_v13 = vpop.eup %1416  ;;  %v1090_v15 = vmul.f32 %v2132_v59, %v1054_v17  ;;  %v1155_v24 = vadd.f32 %v1154_v34, %v1788_v10  ;;  %v901_v20 = vmul.f32 1.442695, %v882_v39  ;;  %v885_v0 = vmul.f32 -2.0, %v873_v5 }
 0x321   :  { %v1109_v23 = vadd.f32 %v1084_v42, %v1081_v1  ;;  %v1419_v3 = vpop.eup %1418  ;;  %v911_v45 = vadd.f32 1.0, %v1417_v13  ;;  %1424 = vpow2.f32 %v899_v53  ;;  %v1136_v31 = vadd.f32 %v1135_v4, %v1134_v9 }
 0x322   :  { %v920_v18 = vadd.f32 1.0, %v1419_v3  ;;  %v905_v38 = vmul.f32 1.442695, %v884_v16  ;;  %v914_v8 = vmul.f32 -0.5, %v1417_v13  ;;  %v1156_v52 = vrot.slane %v1155_v24, 2 }
 0x323   :  { %v1421_v63 = vpop.eup %1420  ;;  %v1110_v55 = vadd.f32 %v1109_v23, %v1087_v37  ;;  %1426 = vlog2.f32 %v911_v45  ;;  %v923_v44 = vmul.f32 -0.5, %v1419_v3  ;;  %v907_v17 = vmul.f32 1.442695, %v885_v0 }
 0x324   :  { %v938_v54 = vadd.f32 1.0, %v1421_v63  ;;  %1428 = vlog2.f32 %v920_v18  ;;  %v1423_v35 = vpop.eup %1422  ;;  %v941_v10 = vmul.f32 -0.5, %v1421_v63  ;;  %v1137_v42 = vrot.slane %v1136_v31, 1 }
 0x325   :  { %v1111_v58 = vadd.f32 %v1110_v55, %v1090_v15  ;;  %v947_v27 = vadd.f32 1.0, %v1423_v35  ;;  %v917_v34 = vand.u32 2147483647, %v1417_v13  ;;  %v915_v53 = vadd.f32 1.0, %v914_v8 }
 0x326   :  { %1430 = vlog2.f32 %v938_v54  ;;  %v950_v39 = vmul.f32 -0.5, %v1423_v35  ;;  %v924_v23 = vadd.f32 1.0, %v923_v44  ;;  %v926_v4 = vand.u32 2147483647, %v1419_v3 }
 0x327   :  { %v1112_v57 = vrot.slane %v1111_v58, 4  ;;  %1432 = vpow2.f32 %v901_v20  ;;  %v2142_v45 = vadd.f32 %v1156_v52, %v1155_v24  ;;  %v942_v16 = vadd.f32 1.0, %v941_v10 }
 0x328   :  { %1434 = vlog2.f32 %v947_v27  ;;  %v1138_v18 = vadd.f32 %v1137_v42, %v1136_v31  ;;  %vm2145_vm1 = vcmp.lt.f32.partialorder %v917_v34, 0.0004427343  ;;  %v944_v20 = vand.u32 2147483647, %v1421_v63 }
 0x329   :  { %v1113_v1 = vadd.f32 %v1112_v57, %v1111_v58  ;;  %1436 = vpow2.f32 %v905_v38  ;;  %v953_v58 = vand.u32 2147483647, %v1423_v35  ;;  %v916_v57 = vmul.f32 %v1417_v13, %v915_v53 }
 0x32a   :  { %1438 = vpow2.f32 %v907_v17  ;;  %v951_v8 = vadd.f32 1.0, %v950_v39  ;;  %v925_v24 = vmul.f32 %v1419_v3, %v924_v23  ;;  %vm927_vm2 = vcmp.lt.f32.partialorder %v926_v4, 0.0004427343 }
 0x32b   :  { %v2140_v37 = vpop.eup %1424  ;;  %v1114_v9 = vrot.slane %v1113_v1, 2  ;;  %v943_v17 = vmul.f32 %v1421_v63, %v942_v16  ;;  %vm945_vm3 = vcmp.lt.f32.partialorder %v944_v20, 0.0004427343  ;;  %vm2156_vm5 = vcmp.lt.f32.partialorder %v953_v58, 0.0004427343 }
 0x32c   :  { %v965_v15 = vadd.f32 1.0, %v2140_v37  ;;  %v968_v42 = vmul.f32 -0.5, %v2140_v37  ;;  %v1158_v48 = vrot.slane %v2142_v45, 1 }
 0x32d   :  { %v1427_v55 = vpop.eup %1426  ;;  %v1115_v52 = vadd.f32 %v1114_v9, %v1113_v1  ;;  %v952_v9 = vmul.f32 %v1423_v35, %v951_v8 }
 0x32e   :  { %v1429_v0 = vpop.eup %1428  ;;  %v913_v38 = vmul.f32 0.6931472, %v1427_v55  ;;  %1440 = vlog2.f32 %v965_v15  ;;  %v969_v54 = vadd.f32 1.0, %v968_v42 }
 0x32f   :  { %v922_v44 = vmul.f32 0.6931472, %v1429_v0  ;;  %v1116_v16 = vrot.slane %v1115_v52, 1 }
 0x330   :  { %v1431_v27 = vpop.eup %1430  ;;  %v919_v10 = vsel %vm2145_vm1, %v916_v57, %v913_v38  ;;  %v971_v38 = vand.u32 2147483647, %v2140_v37  ;;  %v1141_v57 = vmul.f32 0.5, %v1138_v18 }
 0x331   :  { %v940_v31 = vmul.f32 0.6931472, %v1431_v27  ;;  %v2152_v34 = vpop.eup %1432  ;;  %v1019_v55 = vadd.f32 %v919_v10, %v863_v28  ;;  %v928_v13 = vsel %vm927_vm2, %v925_v24, %v922_v44  ;;  %v1117_v56 = vadd.f32 %v1116_v16, %v1115_v52 }
 0x332   :  { %v1435_v3 = vpop.eup %1434  ;;  %v1020_v1 = vadd.f32 %v928_v13, %v864_v32  ;;  %v974_v63 = vadd.f32 1.0, %v2152_v34  ;;  %v977_v27 = vmul.f32 -0.5, %v2152_v34  ;;  %v970_v10 = vmul.f32 %v2140_v37, %v969_v54 }
 0x333   :  { %v946_v39 = vsel %vm945_vm3, %v943_v17, %v940_v31  ;;  %v2163_v23 = vpop.eup %1436  ;;  %v1031_v4 = vmul.f32 0.5, %v1019_v55  ;;  %v949_v28 = vmul.f32 0.6931472, %v1435_v3  ;;  %vm972_vm6 = vcmp.lt.f32.partialorder %v971_v38, 0.0004427343 }
 0x334   :  { %v1022_v2 = vadd.f32 %v946_v39, %v866_v46  ;;  %v1032_v15 = vmul.f32 0.5, %v1020_v1  ;;  %1442 = vlog2.f32 %v974_v63  ;;  %v992_v20 = vadd.f32 1.0, %v2163_v23  ;;  %v2168_v58 = vpop.eup %1438 }
 0x335   :  { %v1043_v32 = vadd.f32 %v1031_v4, %v1978_v26  ;;  %v955_v0 = vsel %vm2156_vm5, %v952_v9, %v949_v28  ;;  %v1001_v31 = vadd.f32 1.0, %v2168_v58  ;;  %v995_v18 = vmul.f32 -0.5, %v2163_v23 }
 0x336   :  { %v1034_v35 = vmul.f32 0.5, %v1022_v2  ;;  %v1023_v46 = vadd.f32 %v955_v0, %v867_v21  ;;  %1444 = vlog2.f32 %v992_v20  ;;  %v1044_v26 = vadd.f32 %v1032_v15, %v1971_v36 }
 0x337   :  { %v1079_v6 = vmul.f32 %v2097_v62, %v1043_v32  ;;  %1446 = vlog2.f32 %v1001_v31  ;;  %v978_v55 = vadd.f32 1.0, %v977_v27  ;;  %v1162_v13 = vadd.f32 %v1141_v57, %v1117_v56 }
 0x338   :  { %v1046_v8 = vadd.f32 %v1034_v35, %v1967_v47  ;;  %v1441_v44 = vpop.eup %1440  ;;  %v1035_v24 = vmul.f32 0.5, %v1023_v46  ;;  %v1159_v47 = vadd.f32 %v1158_v48, %v2142_v45  ;;  %v1080_v37 = vmul.f32 %v2097_v62, %v1044_v26 }
 0x339   :  { %v967_v17 = vmul.f32 0.6931472, %v1441_v44  ;;  %v980_v1 = vand.u32 2147483647, %v2152_v34  ;;  %v996_v39 = vadd.f32 1.0, %v995_v18  ;;  %v1004_v45 = vmul.f32 -0.5, %v2168_v58 }
 0x33a   :  { %v1082_v21 = vmul.f32 %v2109_v14, %v1046_v8  ;;  %v1047_v42 = vadd.f32 %v1035_v24, %v1974_v22  ;;  %v2195_v9 = vadd.f32 %v1162_v13, %v1159_v47  ;;  %v998_v2 = vand.u32 2147483647, %v2163_v23 }
 0x33b   :  { %v973_v36 = vsel %vm972_vm6, %v970_v10, %v967_v17  ;;  %v1121_v28 = vrot.slane %v1118_v40, 4  ;;  %v1119_v62 = vmul.f32 %v1786_v7, %v1786_v7  ;;  %v979_v29 = vmul.f32 %v2152_v34, %v978_v55 }
 0x33c   :  { %v1091_v52 = vadd.f32 %v1082_v21, %v1079_v6  ;;  %v1083_v53 = vmul.f32 %v2109_v14, %v1047_v42  ;;  %v1025_v3 = vadd.f32 %v973_v36, %v869_v25  ;;  %vm981_vm7 = vcmp.lt.f32.partialorder %v980_v1, 0.0004427343 }
 0x33d   :  { %v997_v20 = vmul.f32 %v2163_v23, %v996_v39  ;;  %v1005_v32 = vadd.f32 1.0, %v1004_v45  ;;  %vm999_vm8 = vcmp.lt.f32.partialorder %v998_v2, 0.0004427343  ;;  %v1007_v7 = vand.u32 2147483647, %v2168_v58 }
 0x33e   :  { %v1443_v22 = vpop.eup %1442  ;;  %v1100_v63 = vadd.f32 %v1083_v53, %v1080_v37  ;;  %v1037_v4 = vmul.f32 0.5, %v1025_v3  ;;  %v1122_v48 = vadd.f32 %v1121_v28, %v1118_v40  ;;  %v1127_v46 = vrot.slane %v1119_v62, 4 }
 0x33f   :  { %v976_v14 = vmul.f32 0.6931472, %v1443_v22  ;;  %v1006_v23 = vmul.f32 %v2168_v58, %v1005_v32  ;;  %v1142_v56 = vrot.slane %v1790_v12, 4  ;;  %vm1008_vm9 = vcmp.lt.f32.partialorder %v1007_v7, 0.0004427343 }
 0x340   :  { %v1445_v25 = vpop.eup %1444  ;;  %v1049_v16 = vadd.f32 %v1037_v4, %v2004_v51  ;;  %v1123_v44 = vrot.slane %v1122_v48, 2  ;;  %v1128_v26 = vadd.f32 %v1127_v46, %v1119_v62  ;;  %v1476_v62 = vmov 1966171168  }
 0x341   :  { %v982_v15 = vsel %vm981_vm7, %v979_v29, %v976_v14  ;;  %v994_v54 = vmul.f32 0.6931472, %v1445_v25  ;;  %v1447_v38 = vpop.eup %1446  ;;  %v1143_v58 = vadd.f32 %v1142_v56, %v1790_v12  ;;  %v1171_v14 = vunpack.c.l.s4 %v1476_v62 }
 0x342   :  { %v1085_v35 = vmul.f32 %v2126_v43, %v1049_v16  ;;  %v1026_v0 = vadd.f32 %v982_v15, %v870_v60  ;;  %v1003_v27 = vmul.f32 0.6931472, %v1447_v38  ;;  %v1124_v21 = vadd.f32 %v1123_v44, %v1122_v48 }
 0x343   :  { %v1000_v34 = vsel %vm999_vm8, %v997_v20, %v994_v54  ;;  %v1129_v17 = vrot.slane %v1128_v26, 2  ;;  %v1144_v42 = vrot.slane %v1143_v58, 2  ;;  %v1173_v29 = vlaneseq }
 0x344   :  { %v1092_v57 = vadd.f32 %v1091_v52, %v1085_v35  ;;  %v1038_v51 = vmul.f32 0.5, %v1026_v0  ;;  %v1028_v8 = vadd.f32 %v1000_v34, %v872_v61  ;;  %v1009_v40 = vsel %vm1008_vm9, %v1006_v23, %v1003_v27 }
 0x345   :  { %v1029_v50 = vadd.f32 %v1009_v40, %v873_v5  ;;  %v1148_v61 = vrot.slane %v1792_v30, 4  ;;  %v1125_v5 = vrot.slane %v1124_v21, 1  ;;  %v1130_v52 = vadd.f32 %v1129_v17, %v1128_v26 }
 0x346   :  { %v1050_v11 = vadd.f32 %v1038_v51, %v1998_v19  ;;  %v1040_v60 = vmul.f32 0.5, %v1028_v8  ;;  %v1145_v12 = vadd.f32 %v1144_v42, %v1143_v58  ;;  %v1172_v0 = vunpack.c.0.s8 %v1171_v14 }
 0x347   :  { %v1041_v19 = vmul.f32 0.5, %v1029_v50  ;;  %v1126_v3 = vadd.f32 %v1125_v5, %v1124_v21  ;;  %v1131_v1 = vrot.slane %v1130_v52, 1  ;;  %v1174_v7 = vshrl.u32 %v1173_v29, 7 }
 0x348   :  { %v1086_v24 = vmul.f32 %v2126_v43, %v1050_v11  ;;  %v1052_v10 = vadd.f32 %v1040_v60, %v1995_v33  ;;  %v1149_v43 = vadd.f32 %v1148_v61, %v1792_v30  ;;  %v1146_v22 = vrot.slane %v1145_v12, 1 }
 0x349   :  { %v1053_v47 = vadd.f32 %v1041_v19, %v2001_v49  ;;  %v1139_v30 = vmul.f32 0.5, %v1126_v3  ;;  %v1132_v2 = vadd.f32 %v1131_v1, %v1130_v52  ;;  %v1175_v38 = vsub.s32 %v1172_v0, %v1174_v7 }
 0x34a   :  { %v1101_v31 = vadd.f32 %v1100_v63, %v1086_v24  ;;  %v1088_v6 = vmul.f32 %v2132_v59, %v1052_v10  ;;  %v1150_v13 = vrot.slane %v1149_v43, 2  ;;  %v1147_v25 = vadd.f32 %v1146_v22, %v1145_v12 }
 0x34b   :  { %v1089_v41 = vmul.f32 %v2132_v59, %v1053_v47  ;;  %v1140_v20 = vmul.f32 0.5, %v1132_v2  ;;  %v1183_v8 = vrot.slane %v2195_v9, %v1175_v38  ;;  %vm1195_vm10 = vcmp.lt.s32.totalorder %v1173_v29, 384 }
 0x34c   :  { %v1093_v18 = vadd.f32 %v1092_v57, %v1088_v6  ;;  %v1151_v49 = vadd.f32 %v1150_v13, %v1149_v43 }
 0x34d   :  { %v1102_v55 = vadd.f32 %v1101_v31, %v1089_v41 }
 0x34e   :  { %v1094_v33 = vrot.slane %v1093_v18, 4  ;;  %v1152_v16 = vrot.slane %v1151_v49, 1 }
 0x34f   :  { %v1103_v53 = vrot.slane %v1102_v55, 4 }
 0x350   :  { %v1095_v36 = vadd.f32 %v1094_v33, %v1093_v18  ;;  %v1153_v48 = vadd.f32 %v1152_v16, %v1151_v49 }
 0x351   :  { %v1104_v45 = vadd.f32 %v1103_v53, %v1102_v55 }
 0x352   :  { %v1096_v37 = vrot.slane %v1095_v36, 2 }
 0x353   :  { %v1105_v4 = vrot.slane %v1104_v45, 2 }
 0x354   :  { %v1097_v39 = vadd.f32 %v1096_v37, %v1095_v36 }
 0x355   :  { %v1106_v59 = vadd.f32 %v1105_v4, %v1104_v45 }
 0x356   :  { %v1098_v63 = vrot.slane %v1097_v39, 1 }
 0x357   :  { %v1107_v15 = vrot.slane %v1106_v59, 1 }
 0x358   :  { %v1099_v28 = vadd.f32 %v1098_v63, %v1097_v39 }
 0x359   :  { %v1108_v32 = vadd.f32 %v1107_v15, %v1106_v59 }
 0x35a   :  { %v1160_v54 = vadd.f32 %v1139_v30, %v1099_v28 }
 0x35b   :  { %v1161_v46 = vadd.f32 %v1140_v20, %v1108_v32 }
 0x35c   :  { %v1163_v35 = vadd.f32 %v1160_v54, %v1147_v25 }
 0x35d   :  { %v1164_v34 = vadd.f32 %v1161_v46, %v1153_v48 }
 0x35f   :  { %v1169_v57 = vcombine.low %v1163_v35, %v1164_v34 }
 0x361   :  { %v1176_v51 = vrot.slane %v1169_v57, %v1175_v38 }
 0x363   :  { %v1184_v27 = vcombine.low %v1176_v51, %v1183_v8 }
 0x365   :  { %v1191_v23 = vrot.slane %v1184_v27, %v1175_v38 }
 0x367   :  { %1197 = vst.msk [vmem:[#allocation2] sm:$0x7] %vm1195_vm10, %v1191_v23 }
 0x368   :  { %1459 = shalt.err (!%p1456_p4)
}
 0x369   :  { %s1460_s9 = scalar_lea.hbm %s2240_s5, 48 }
 0x36a   :  { %p1461_p5 = scmp.ne.s32.totalorder %s2240_s5, %s1460_s9  ;;  %p1464_p6 = scmp.lt.u32.totalorder %s1460_s9, %s2240_s5 }
 0x36c   :  { %p1466_p7 = pnand %p1464_p6, %p1461_p5 }
 0x36e   :  { %1469 = shalt.err (!%p1466_p7)
}
 0x36f   :  { %1207 = dma.vmem_to_hbm [thread:$0]  %s1205_s30, 48, %s2240_s5, [#allocation3]  }
 0x370   :  { %1470 = dma.done.wait [#allocation3], 48  }
 0x371   :  { %1471 = vsyncadd [#allocation3], 4294967248 }
 0x372   :  { %1211 = vsyncpa [#allocation3], 1 }

</bundles_post_ra>
